<compile_context>
chip_gen: v6e
topology: v6e:2x2x1
jax: 0.10.0
libtpu: 0.0.40
codegen_flags: <defaults>
</compile_context>

<pallas_src>
import jax
import jax.numpy as jnp
from jax.experimental import pallas as pl
from jax.experimental.pallas import tpu as pltpu

# ---------------- small synthetic config ----------------
VOCAB = 64
HIDDEN = 32
N_HEADS = 4
N_KV_HEADS = 2
HEAD_DIM = HIDDEN // N_HEADS          # 8
N_REP = N_HEADS // N_KV_HEADS         # 2
INTER = 64
N_LAYERS = 2
SEQ = 8
BATCH = 2
EPS = 1e-6
THETA = 10000.0

DQ = N_HEADS * HEAD_DIM               # 32
DK = N_KV_HEADS * HEAD_DIM            # 16
NEG_FILL = -1e30                      # finite mask fill: no NaN even for fully-masked rows


# ---------------- fused Pallas kernel (one grid step == one batch element) ----------------
def llama_fused_kernel(ids_ref, embed_ref,
                       an_ref, wqkvr_ref, wo_ref,
                       pn_ref, wgu_ref, wd_ref,
                       fn_ref, cos_ref, sin_ref,
                       out_ref):
    f32 = jnp.float32
    bf16 = jnp.bfloat16

    # ---- embedding gather as ONE one-hot matmul (MXU) ----
    ids_col = ids_ref[0]                                               # (SEQ, 1) int32
    vocab_iota = jax.lax.broadcasted_iota(jnp.int32, (SEQ, VOCAB), 1)
    onehot = (vocab_iota == ids_col).astype(f32)                       # (SEQ, VOCAB)
    x = jnp.dot(onehot, embed_ref[...], preferred_element_type=f32)    # (SEQ, HIDDEN) residual

    cos = cos_ref[...]                                                 # (SEQ, DQ) f32
    sin = sin_ref[...]
    scale = 1.0 / (float(HEAD_DIM) ** 0.5)

    # per-head causal mask for this batch element, built once in-kernel
    ri = jax.lax.broadcasted_iota(jnp.int32, (N_HEADS, SEQ, SEQ), 1)
    ci = jax.lax.broadcasted_iota(jnp.int32, (N_HEADS, SEQ, SEQ), 2)
    causal = ri >= ci

    def rmsnorm(v, w):                                                 # all-f32 elementwise (v5e safe)
        var = jnp.mean(v * v, axis=-1, keepdims=True)
        return w * (v * jax.lax.rsqrt(var + EPS))

    def split_heads(t):                                                # (SEQ, DQ) -> (NH, SEQ, HD)
        return jnp.stack(
            [t[:, h * HEAD_DIM:(h + 1) * HEAD_DIM] for h in range(N_HEADS)], axis=0)

    for l in range(N_LAYERS):                                          # static unroll over layers
        # ---- attention block ----
        hb = rmsnorm(x, an_ref[l]).astype(bf16)                        # (SEQ, HIDDEN) bf16
        # one fused projection -> [q | rot(q) | k | rot(k) | v] (pair rotation folded into weights)
        qkvr = jnp.dot(hb, wqkvr_ref[l], preferred_element_type=f32)   # (SEQ, 5*DQ) f32
        # RoPE combined entirely in f32: x*cos + rot(x)*sin
        q = qkvr[:, 0 * DQ:1 * DQ] * cos + qkvr[:, 1 * DQ:2 * DQ] * sin
        k = qkvr[:, 2 * DQ:3 * DQ] * cos + qkvr[:, 3 * DQ:4 * DQ] * sin
        v = qkvr[:, 4 * DQ:5 * DQ]

        qh = split_heads(q).astype(bf16)                               # (NH, SEQ, HD)
        kh = split_heads(k).astype(bf16)
        vh = split_heads(v).astype(bf16)

        # per-head batched attention: no cross-head/batch MACs, exp() or reduction waste
        s = jnp.einsum('hqd,hkd->hqk', qh, kh,
                       preferred_element_type=f32) * scale             # (NH, SEQ, SEQ) f32
        s = jnp.where(causal, s, NEG_FILL)
        p = jnp.exp(s - jnp.max(s, axis=-1, keepdims=True))
        p = p / jnp.sum(p, axis=-1, keepdims=True)                     # exact reciprocal
        o = jnp.einsum('hqk,hkd->hqd', p.astype(bf16), vh,
                       preferred_element_type=f32)                     # (NH, SEQ, HD) f32

        # restore (SEQ, NH*HD) head-major column layout, then output projection + residual
        attn = jnp.concatenate([o[h] for h in range(N_HEADS)], axis=1)
        x = x + jnp.dot(attn.astype(bf16), wo_ref[l], preferred_element_type=f32)

        # ---- SwiGLU MLP (gate/up fused into one 128-lane-dense matmul) ----
        h2 = rmsnorm(x, pn_ref[l]).astype(bf16)
        gu = jnp.dot(h2, wgu_ref[l], preferred_element_type=f32)       # (SEQ, 2*INTER)
        g = gu[:, :INTER]
        u = gu[:, INTER:]
        m = (g * jax.nn.sigmoid(g)) * u
        x = x + jnp.dot(m.astype(bf16), wd_ref[l], preferred_element_type=f32)

    # ---- final RMSNorm ----
    out_ref[0] = rmsnorm(x, fn_ref[...]).astype(out_ref.dtype)


# ---------------- wrappers ----------------
def build_rope(seq_len):
    # matches precompute_freqs_cis + interleaved (even,odd) complex pairing of apply_rotary_emb
    inv = 1.0 / (THETA ** (jnp.arange(0, HEAD_DIM, 2, dtype=jnp.float32) / HEAD_DIM))
    ang = jnp.outer(jnp.arange(seq_len, dtype=jnp.float32), inv)        # (S, hd/2)
    cos = jnp.repeat(jnp.cos(ang), 2, axis=-1)                          # (S, hd) [c0,c0,c1,c1,...]
    sin = jnp.repeat(jnp.sin(ang), 2, axis=-1)
    return jnp.tile(cos, (1, N_HEADS)), jnp.tile(sin, (1, N_HEADS))     # (S, DQ) each


def _pair_rotation():
    # (x @ R)[2i] = -x[2i+1], (x @ R)[2i+1] = x[2i]  (RoPE pair rotation)
    R = jnp.zeros((DQ, DQ), jnp.float32)
    i = jnp.arange(0, DQ, 2)
    R = R.at[i + 1, i].set(-1.0)
    R = R.at[i, i + 1].set(1.0)
    return R


def init_params(key):
    keys = jax.random.split(key, 1 + N_LAYERS)
    embed = jax.random.normal(keys[0], (VOCAB, HIDDEN), jnp.float32) * 0.02

    def lin(k, out_f, in_f):
        # torch.nn.Linear weight is (out,in); store transposed (in,out) for y = x @ W
        return (jax.random.normal(k, (out_f, in_f), jnp.float32) * 0.02).T

    layers = []
    for l in range(N_LAYERS):
        ks = jax.random.split(keys[1 + l], 7)
        layers.append(dict(
            attn_norm=jnp.ones((1, HIDDEN), jnp.float32),
            wq_t=lin(ks[0], DQ, HIDDEN),
            wk_t=lin(ks[1], DK, HIDDEN),
            wv_t=lin(ks[2], DK, HIDDEN),
            wo_t=lin(ks[3], HIDDEN, DQ),
            post_norm=jnp.ones((1, HIDDEN), jnp.float32),
            wg_t=lin(ks[4], INTER, HIDDEN),
            wu_t=lin(ks[5], INTER, HIDDEN),
            wd_t=lin(ks[6], HIDDEN, INTER),
        ))
    norm_w = jnp.ones((1, HIDDEN), jnp.float32)
    return embed, layers, norm_w


def _stack_weights(layers):
    """Stack per-layer weights with a leading (L,) axis, cast MXU operands to bf16, fold GQA
    repeat_kv into the K/V projection weights, fold the RoPE pair-rotation into extra fused
    projection columns, and fuse gate/up."""
    bf16 = jnp.bfloat16
    R = _pair_rotation()

    def rep_kv(w):   # (H, DK) -> (H, DQ): query head h uses kv head h // N_REP
        return jnp.repeat(w.reshape(HIDDEN, N_KV_HEADS, HEAD_DIM), N_REP, axis=1).reshape(HIDDEN, DQ)

    an, pn, wqkvr, wo, wgu, wd = [], [], [], [], [], []
    for p in layers:
        wq = p["wq_t"]
        wk = rep_kv(p["wk_t"])
        wv = rep_kv(p["wv_t"])
        # [q | rot(q) | k | rot(k) | v]: wq @ R is an exact signed column permutation of wq,
        # so bf16-casting the fused weight keeps RoPE effectively f32 in the kernel.
        wqkvr.append(jnp.concatenate([wq, wq @ R, wk, wk @ R, wv], axis=1))   # (H, 5*DQ)
        wo.append(p["wo_t"])
        wgu.append(jnp.concatenate([p["wg_t"], p["wu_t"]], axis=1))           # (H, 2*INTER)
        wd.append(p["wd_t"])
        an.append(p["attn_norm"])
        pn.append(p["post_norm"])

    return dict(
        an=jnp.stack(an), pn=jnp.stack(pn),                                   # (L, 1, H) f32
        wqkvr=jnp.stack(wqkvr).astype(bf16),                                  # (L, H, 5*DQ)
        wo=jnp.stack(wo).astype(bf16),                                        # (L, DQ, H)
        wgu=jnp.stack(wgu).astype(bf16),                                      # (L, H, 2*INTER)
        wd=jnp.stack(wd).astype(bf16),                                        # (L, INTER, H)
    )


def _resident(arr):
    # whole array VMEM-resident: constant block index across the (parallel) batch grid axis
    n = arr.ndim
    return pl.BlockSpec(arr.shape, lambda b: (0,) * n)


@jax.jit
def llama_model(input_ids, embed, layers, norm_w):
    w = _stack_weights(layers)
    cos_q, sin_q = build_rope(SEQ)
    ids3 = input_ids.astype(jnp.int32).reshape(BATCH, SEQ, 1)          # (B, S, 1): (SEQ,1) tile per step

    out = pl.pallas_call(
        llama_fused_kernel,
        out_shape=jax.ShapeDtypeStruct((BATCH, SEQ, HIDDEN), jnp.float32),
        grid=(BATCH,),
        in_specs=[
            pl.BlockSpec((1, SEQ, 1), lambda b: (b, 0, 0)),            # token ids of this batch
            _resident(embed),
            _resident(w["an"]), _resident(w["wqkvr"]), _resident(w["wo"]),
            _resident(w["pn"]), _resident(w["wgu"]), _resident(w["wd"]),
            _resident(norm_w), _resident(cos_q), _resident(sin_q),
        ],
        out_specs=pl.BlockSpec((1, SEQ, HIDDEN), lambda b: (b, 0, 0)),
        compiler_params=pltpu.CompilerParams(dimension_semantics=("parallel",)),
    )(ids3, embed,
      w["an"], w["wqkvr"], w["wo"], w["pn"], w["wgu"], w["wd"],
      norm_w, cos_q, sin_q)
    return out


# ---------------- pure-JAX reference (same math, f32, no Pallas) ----------------
def ref_model(input_ids, embed, layers, norm_w):
    def rmsnorm(x, w):
        var = jnp.mean(x * x, axis=-1, keepdims=True)
        return w.reshape(-1) * (x * jax.lax.rsqrt(var + EPS))

    h = embed[input_ids]
    B, S, H = h.shape
    inv = 1.0 / (THETA ** (jnp.arange(0, HEAD_DIM, 2, dtype=jnp.float32) / HEAD_DIM))
    ang = jnp.outer(jnp.arange(S, dtype=jnp.float32), inv)
    fc = jnp.cos(ang) + 1j * jnp.sin(ang)                       # (S, hd/2)
    mask = jnp.triu(jnp.full((S, S), -jnp.inf, jnp.float32), k=1)

    def rope(x):
        xc = x.reshape(*x.shape[:-1], -1, 2)
        xc = xc[..., 0] + 1j * xc[..., 1]
        xc = xc * fc[None, :, None, :]
        return jnp.stack([xc.real, xc.imag], axis=-1).reshape(x.shape)

    for p in layers:
        hn = rmsnorm(h, p["attn_norm"])
        q = (hn @ p["wq_t"]).reshape(B, S, N_HEADS, HEAD_DIM)
        k = (hn @ p["wk_t"]).reshape(B, S, N_KV_HEADS, HEAD_DIM)
        v = (hn @ p["wv_t"]).reshape(B, S, N_KV_HEADS, HEAD_DIM)
        q, k = rope(q), rope(k)
        k = jnp.repeat(k, N_REP, axis=2)
        v = jnp.repeat(v, N_REP, axis=2)
        q, k, v = (t.transpose(0, 2, 1, 3) for t in (q, k, v))
        s = q @ k.transpose(0, 1, 3, 2) / jnp.sqrt(jnp.float32(HEAD_DIM)) + mask
        s = jax.nn.softmax(s, axis=-1)
        o = (s @ v).transpose(0, 2, 1, 3).reshape(B, S, -1)
        h = h + o @ p["wo_t"]
        hn = rmsnorm(h, p["post_norm"])
        g = hn @ p["wg_t"]
        u = hn @ p["wu_t"]
        h = h + ((g * jax.nn.sigmoid(g)) * u) @ p["wd_t"]
    return rmsnorm(h, norm_w)


if __name__ == "__main__":
    key = jax.random.PRNGKey(0)
    k_ids, k_params = jax.random.split(key)
    input_ids = jax.random.randint(k_ids, (BATCH, SEQ), 0, VOCAB)
    embed, layers, norm_w = init_params(k_params)

    out = llama_model(input_ids, embed, layers, norm_w)
    out = jax.block_until_ready(out)

    with jax.default_matmul_precision("float32"):
        ref = ref_model(input_ids, embed, layers, norm_w)
    assert out.shape == (BATCH, SEQ, HIDDEN)
    # bf16 MXU operands (f32 accumulation) vs the all-f32 reference -> slightly loose tolerance
    assert jnp.allclose(out, ref, atol=2e-2, rtol=2e-2), "mismatch vs reference"

    print("KERNEL_OK")
</pallas_src>

<mosaic_0001>
module attributes {stable_mosaic.version = 11 : i64} {
  func.func @llama_fused_kernel(%arg0: i32, %arg1: memref<1x8x1xi32, #tpu.memory_space<vmem>>, %arg2: memref<64x32xf32, #tpu.memory_space<vmem>>, %arg3: memref<2x1x32xf32, #tpu.memory_space<vmem>>, %arg4: memref<2x32x160xbf16, #tpu.memory_space<vmem>>, %arg5: memref<2x32x32xbf16, #tpu.memory_space<vmem>>, %arg6: memref<2x1x32xf32, #tpu.memory_space<vmem>>, %arg7: memref<2x32x128xbf16, #tpu.memory_space<vmem>>, %arg8: memref<2x64x32xbf16, #tpu.memory_space<vmem>>, %arg9: memref<1x32xf32, #tpu.memory_space<vmem>>, %arg10: memref<8x32xf32, #tpu.memory_space<vmem>>, %arg11: memref<8x32xf32, #tpu.memory_space<vmem>>, %arg12: memref<1x8x32xf32, #tpu.memory_space<vmem>>) attributes {dimension_semantics = [#tpu.dimension_semantics<parallel>], iteration_bounds = array<i64: 2>, scalar_prefetch = 0 : i64, scratch_operands = 0 : i64, tpu.core_type = #tpu.core_type<tc>, window_params = [{transform_indices = @transform_0, window_bounds = array<i64: 1, 8, 1>}, {pipeline_mode = #tpu.pipeline_mode<synchronous>, transform_indices = @transform_1, window_bounds = array<i64: 64, 32>}, {pipeline_mode = #tpu.pipeline_mode<synchronous>, transform_indices = @transform_2, window_bounds = array<i64: 2, 1, 32>}, {pipeline_mode = #tpu.pipeline_mode<synchronous>, transform_indices = @transform_3, window_bounds = array<i64: 2, 32, 160>}, {pipeline_mode = #tpu.pipeline_mode<synchronous>, transform_indices = @transform_4, window_bounds = array<i64: 2, 32, 32>}, {pipeline_mode = #tpu.pipeline_mode<synchronous>, transform_indices = @transform_5, window_bounds = array<i64: 2, 1, 32>}, {pipeline_mode = #tpu.pipeline_mode<synchronous>, transform_indices = @transform_6, window_bounds = array<i64: 2, 32, 128>}, {pipeline_mode = #tpu.pipeline_mode<synchronous>, transform_indices = @transform_7, window_bounds = array<i64: 2, 64, 32>}, {pipeline_mode = #tpu.pipeline_mode<synchronous>, transform_indices = @transform_8, window_bounds = array<i64: 1, 32>}, {pipeline_mode = #tpu.pipeline_mode<synchronous>, transform_indices = @transform_9, window_bounds = array<i64: 8, 32>}, {pipeline_mode = #tpu.pipeline_mode<synchronous>, transform_indices = @transform_10, window_bounds = array<i64: 8, 32>}, {transform_indices = @transform_11, window_bounds = array<i64: 1, 8, 32>}]} {
    %c0 = arith.constant 0 : index
    %c0_0 = arith.constant 0 : index
    %c0_1 = arith.constant 0 : index
    %0 = vector.load %arg1[%c0, %c0_0, %c0_1] : memref<1x8x1xi32, #tpu.memory_space<vmem>>, vector<1x8x1xi32>
    %1 = vector.shape_cast %0 : vector<1x8x1xi32> to vector<8x1xi32>
    %2 = tpu.iota {dimensions = array<i32: 1>} : vector<8x64xi32>
    %3 = vector.broadcast %1 : vector<8x1xi32> to vector<8x64xi32>
    %4 = arith.cmpi eq, %2, %3 : vector<8x64xi32>
    %5 = arith.extui %4 : vector<8x64xi1> to vector<8x64xi32>
    %6 = arith.sitofp %5 : vector<8x64xi32> to vector<8x64xf32>
    %c0_2 = arith.constant 0 : index
    %c0_3 = arith.constant 0 : index
    %7 = vector.load %arg2[%c0_2, %c0_3] : memref<64x32xf32, #tpu.memory_space<vmem>>, vector<64x32xf32>
    %cst = arith.constant dense<0.000000e+00> : vector<8x32xf32>
    %8 = tpu.matmul %6, %7, %cst {dimension_numbers = #tpu.dot_dimension_numbers<[1], [0], [0], [1], [0, 0, 1, 1], [], []>} : vector<8x64xf32>, vector<64x32xf32>, vector<8x32xf32> -> vector<8x32xf32>
    %c0_4 = arith.constant 0 : index
    %c0_5 = arith.constant 0 : index
    %9 = vector.load %arg10[%c0_4, %c0_5] : memref<8x32xf32, #tpu.memory_space<vmem>>, vector<8x32xf32>
    %c0_6 = arith.constant 0 : index
    %c0_7 = arith.constant 0 : index
    %10 = vector.load %arg11[%c0_6, %c0_7] : memref<8x32xf32, #tpu.memory_space<vmem>>, vector<8x32xf32>
    %11 = tpu.iota {dimensions = array<i32: 1>} : vector<4x8x8xi32>
    %12 = tpu.iota {dimensions = array<i32: 2>} : vector<4x8x8xi32>
    %13 = arith.cmpi sge, %11, %12 : vector<4x8x8xi32>
    %c0_8 = arith.constant 0 : index
    %c0_9 = arith.constant 0 : index
    %c0_10 = arith.constant 0 : index
    %14 = vector.load %arg3[%c0_8, %c0_9, %c0_10] : memref<2x1x32xf32, #tpu.memory_space<vmem>>, vector<1x1x32xf32>
    %15 = vector.shape_cast %14 : vector<1x1x32xf32> to vector<1x32xf32>
    %16 = arith.mulf %8, %8 : vector<8x32xf32>
    %cst_11 = arith.constant dense<0.000000e+00> : vector<8xf32>
    %17 = vector.multi_reduction <add>, %16, %cst_11 [1] : vector<8x32xf32> to vector<8xf32>
    %18 = vector.shape_cast %17 : vector<8xf32> to vector<8x1xf32>
    %cst_12 = arith.constant 3.200000e+01 : f32
    %19 = vector.broadcast %cst_12 : f32 to vector<8x1xf32>
    %20 = arith.divf %18, %19 : vector<8x1xf32>
    %cst_13 = arith.constant 9.99999997E-7 : f32
    %21 = vector.broadcast %cst_13 : f32 to vector<8x1xf32>
    %22 = arith.addf %20, %21 : vector<8x1xf32>
    %23 = math.rsqrt %22 : vector<8x1xf32>
    %24 = vector.broadcast %23 : vector<8x1xf32> to vector<8x32xf32>
    %25 = arith.mulf %8, %24 : vector<8x32xf32>
    %26 = vector.broadcast %15 : vector<1x32xf32> to vector<8x32xf32>
    %27 = arith.mulf %26, %25 : vector<8x32xf32>
    %28 = arith.truncf %27 : vector<8x32xf32> to vector<8x32xbf16>
    %c0_14 = arith.constant 0 : index
    %c0_15 = arith.constant 0 : index
    %c0_16 = arith.constant 0 : index
    %29 = vector.load %arg4[%c0_14, %c0_15, %c0_16] : memref<2x32x160xbf16, #tpu.memory_space<vmem>>, vector<1x32x160xbf16>
    %30 = vector.shape_cast %29 : vector<1x32x160xbf16> to vector<32x160xbf16>
    %cst_17 = arith.constant dense<0.000000e+00> : vector<8x160xf32>
    %31 = tpu.matmul %28, %30, %cst_17 {dimension_numbers = #tpu.dot_dimension_numbers<[1], [0], [0], [1], [0, 0, 1, 1], [], []>} : vector<8x32xbf16>, vector<32x160xbf16>, vector<8x160xf32> -> vector<8x160xf32>
    %32 = vector.extract_strided_slice %31 {offsets = [0, 0], sizes = [8, 32], strides = [1, 1]} : vector<8x160xf32> to vector<8x32xf32>
    %33 = arith.mulf %32, %9 : vector<8x32xf32>
    %34 = vector.extract_strided_slice %31 {offsets = [0, 32], sizes = [8, 32], strides = [1, 1]} : vector<8x160xf32> to vector<8x32xf32>
    %35 = arith.mulf %34, %10 : vector<8x32xf32>
    %36 = arith.addf %33, %35 : vector<8x32xf32>
    %37 = vector.extract_strided_slice %31 {offsets = [0, 64], sizes = [8, 32], strides = [1, 1]} : vector<8x160xf32> to vector<8x32xf32>
    %38 = arith.mulf %37, %9 : vector<8x32xf32>
    %39 = vector.extract_strided_slice %31 {offsets = [0, 96], sizes = [8, 32], strides = [1, 1]} : vector<8x160xf32> to vector<8x32xf32>
    %40 = arith.mulf %39, %10 : vector<8x32xf32>
    %41 = arith.addf %38, %40 : vector<8x32xf32>
    %42 = vector.extract_strided_slice %31 {offsets = [0, 128], sizes = [8, 32], strides = [1, 1]} : vector<8x160xf32> to vector<8x32xf32>
    %43 = vector.extract_strided_slice %36 {offsets = [0, 0], sizes = [8, 8], strides = [1, 1]} : vector<8x32xf32> to vector<8x8xf32>
    %44 = vector.extract_strided_slice %36 {offsets = [0, 8], sizes = [8, 8], strides = [1, 1]} : vector<8x32xf32> to vector<8x8xf32>
    %45 = vector.extract_strided_slice %36 {offsets = [0, 16], sizes = [8, 8], strides = [1, 1]} : vector<8x32xf32> to vector<8x8xf32>
    %46 = vector.extract_strided_slice %36 {offsets = [0, 24], sizes = [8, 8], strides = [1, 1]} : vector<8x32xf32> to vector<8x8xf32>
    %47 = vector.shape_cast %43 : vector<8x8xf32> to vector<1x8x8xf32>
    %48 = vector.shape_cast %44 : vector<8x8xf32> to vector<1x8x8xf32>
    %49 = vector.shape_cast %45 : vector<8x8xf32> to vector<1x8x8xf32>
    %50 = vector.shape_cast %46 : vector<8x8xf32> to vector<1x8x8xf32>
    %51 = tpu.concatenate %47, %48, %49, %50 in 0 : vector<1x8x8xf32>, vector<1x8x8xf32>, vector<1x8x8xf32>, vector<1x8x8xf32> -> vector<4x8x8xf32>
    %52 = arith.truncf %51 : vector<4x8x8xf32> to vector<4x8x8xbf16>
    %53 = vector.extract_strided_slice %41 {offsets = [0, 0], sizes = [8, 8], strides = [1, 1]} : vector<8x32xf32> to vector<8x8xf32>
    %54 = vector.extract_strided_slice %41 {offsets = [0, 8], sizes = [8, 8], strides = [1, 1]} : vector<8x32xf32> to vector<8x8xf32>
    %55 = vector.extract_strided_slice %41 {offsets = [0, 16], sizes = [8, 8], strides = [1, 1]} : vector<8x32xf32> to vector<8x8xf32>
    %56 = vector.extract_strided_slice %41 {offsets = [0, 24], sizes = [8, 8], strides = [1, 1]} : vector<8x32xf32> to vector<8x8xf32>
    %57 = vector.shape_cast %53 : vector<8x8xf32> to vector<1x8x8xf32>
    %58 = vector.shape_cast %54 : vector<8x8xf32> to vector<1x8x8xf32>
    %59 = vector.shape_cast %55 : vector<8x8xf32> to vector<1x8x8xf32>
    %60 = vector.shape_cast %56 : vector<8x8xf32> to vector<1x8x8xf32>
    %61 = tpu.concatenate %57, %58, %59, %60 in 0 : vector<1x8x8xf32>, vector<1x8x8xf32>, vector<1x8x8xf32>, vector<1x8x8xf32> -> vector<4x8x8xf32>
    %62 = arith.truncf %61 : vector<4x8x8xf32> to vector<4x8x8xbf16>
    %63 = vector.extract_strided_slice %42 {offsets = [0, 0], sizes = [8, 8], strides = [1, 1]} : vector<8x32xf32> to vector<8x8xf32>
    %64 = vector.extract_strided_slice %42 {offsets = [0, 8], sizes = [8, 8], strides = [1, 1]} : vector<8x32xf32> to vector<8x8xf32>
    %65 = vector.extract_strided_slice %42 {offsets = [0, 16], sizes = [8, 8], strides = [1, 1]} : vector<8x32xf32> to vector<8x8xf32>
    %66 = vector.extract_strided_slice %42 {offsets = [0, 24], sizes = [8, 8], strides = [1, 1]} : vector<8x32xf32> to vector<8x8xf32>
    %67 = vector.shape_cast %63 : vector<8x8xf32> to vector<1x8x8xf32>
    %68 = vector.shape_cast %64 : vector<8x8xf32> to vector<1x8x8xf32>
    %69 = vector.shape_cast %65 : vector<8x8xf32> to vector<1x8x8xf32>
    %70 = vector.shape_cast %66 : vector<8x8xf32> to vector<1x8x8xf32>
    %71 = tpu.concatenate %67, %68, %69, %70 in 0 : vector<1x8x8xf32>, vector<1x8x8xf32>, vector<1x8x8xf32>, vector<1x8x8xf32> -> vector<4x8x8xf32>
    %72 = arith.truncf %71 : vector<4x8x8xf32> to vector<4x8x8xbf16>
    "tpu.trace_start"() <{level = 10 : i32, message = "hqd,hkd->hqk"}> : () -> ()
    %cst_18 = arith.constant dense<0.000000e+00> : vector<4x8x8xf32>
    %73 = tpu.matmul %52, %62, %cst_18 {dimension_numbers = #tpu.dot_dimension_numbers<[2], [2], [1], [1], [0, 0, 0, 1, 1, 1], [0], [0]>} : vector<4x8x8xbf16>, vector<4x8x8xbf16>, vector<4x8x8xf32> -> vector<4x8x8xf32>
    "tpu.trace_stop"() : () -> ()
    %cst_19 = arith.constant 0.353553385 : f32
    %74 = vector.broadcast %cst_19 : f32 to vector<4x8x8xf32>
    %75 = arith.mulf %73, %74 : vector<4x8x8xf32>
    %cst_20 = arith.constant -1.000000e+30 : f32
    %76 = vector.broadcast %cst_20 : f32 to vector<4x8x8xf32>
    %77 = arith.select %13, %75, %76 : vector<4x8x8xi1>, vector<4x8x8xf32>
    %cst_21 = arith.constant dense<0xFF800000> : vector<4x8xf32>
    %78 = vector.multi_reduction <maximumf>, %77, %cst_21 [2] : vector<4x8x8xf32> to vector<4x8xf32>
    %79 = vector.shape_cast %78 : vector<4x8xf32> to vector<4x8x1xf32>
    %80 = vector.broadcast %79 : vector<4x8x1xf32> to vector<4x8x8xf32>
    %81 = arith.subf %77, %80 : vector<4x8x8xf32>
    %82 = math.exp %81 : vector<4x8x8xf32>
    %cst_22 = arith.constant dense<0.000000e+00> : vector<4x8xf32>
    %83 = vector.multi_reduction <add>, %82, %cst_22 [2] : vector<4x8x8xf32> to vector<4x8xf32>
    %84 = vector.shape_cast %83 : vector<4x8xf32> to vector<4x8x1xf32>
    %85 = vector.broadcast %84 : vector<4x8x1xf32> to vector<4x8x8xf32>
    %86 = arith.divf %82, %85 : vector<4x8x8xf32>
    %87 = arith.truncf %86 : vector<4x8x8xf32> to vector<4x8x8xbf16>
    "tpu.trace_start"() <{level = 10 : i32, message = "hqk,hkd->hqd"}> : () -> ()
    %cst_23 = arith.constant dense<0.000000e+00> : vector<4x8x8xf32>
    %88 = tpu.matmul %87, %72, %cst_23 {dimension_numbers = #tpu.dot_dimension_numbers<[2], [1], [1], [2], [0, 0, 0, 1, 1, 2], [0], [0]>} : vector<4x8x8xbf16>, vector<4x8x8xbf16>, vector<4x8x8xf32> -> vector<4x8x8xf32>
    "tpu.trace_stop"() : () -> ()
    %89 = vector.extract_strided_slice %88 {offsets = [0, 0, 0], sizes = [1, 8, 8], strides = [1, 1, 1]} : vector<4x8x8xf32> to vector<1x8x8xf32>
    %90 = vector.shape_cast %89 : vector<1x8x8xf32> to vector<8x8xf32>
    %91 = vector.extract_strided_slice %88 {offsets = [1, 0, 0], sizes = [1, 8, 8], strides = [1, 1, 1]} : vector<4x8x8xf32> to vector<1x8x8xf32>
    %92 = vector.shape_cast %91 : vector<1x8x8xf32> to vector<8x8xf32>
    %93 = vector.extract_strided_slice %88 {offsets = [2, 0, 0], sizes = [1, 8, 8], strides = [1, 1, 1]} : vector<4x8x8xf32> to vector<1x8x8xf32>
    %94 = vector.shape_cast %93 : vector<1x8x8xf32> to vector<8x8xf32>
    %95 = vector.extract_strided_slice %88 {offsets = [3, 0, 0], sizes = [1, 8, 8], strides = [1, 1, 1]} : vector<4x8x8xf32> to vector<1x8x8xf32>
    %96 = vector.shape_cast %95 : vector<1x8x8xf32> to vector<8x8xf32>
    %97 = tpu.concatenate %90, %92, %94, %96 in 1 : vector<8x8xf32>, vector<8x8xf32>, vector<8x8xf32>, vector<8x8xf32> -> vector<8x32xf32>
    %98 = arith.truncf %97 : vector<8x32xf32> to vector<8x32xbf16>
    %c0_24 = arith.constant 0 : index
    %c0_25 = arith.constant 0 : index
    %c0_26 = arith.constant 0 : index
    %99 = vector.load %arg5[%c0_24, %c0_25, %c0_26] : memref<2x32x32xbf16, #tpu.memory_space<vmem>>, vector<1x32x32xbf16>
    %100 = vector.shape_cast %99 : vector<1x32x32xbf16> to vector<32x32xbf16>
    %cst_27 = arith.constant dense<0.000000e+00> : vector<8x32xf32>
    %101 = tpu.matmul %98, %100, %cst_27 {dimension_numbers = #tpu.dot_dimension_numbers<[1], [0], [0], [1], [0, 0, 1, 1], [], []>} : vector<8x32xbf16>, vector<32x32xbf16>, vector<8x32xf32> -> vector<8x32xf32>
    %102 = arith.addf %8, %101 : vector<8x32xf32>
    %c0_28 = arith.constant 0 : index
    %c0_29 = arith.constant 0 : index
    %c0_30 = arith.constant 0 : index
    %103 = vector.load %arg6[%c0_28, %c0_29, %c0_30] : memref<2x1x32xf32, #tpu.memory_space<vmem>>, vector<1x1x32xf32>
    %104 = vector.shape_cast %103 : vector<1x1x32xf32> to vector<1x32xf32>
    %105 = arith.mulf %102, %102 : vector<8x32xf32>
    %cst_31 = arith.constant dense<0.000000e+00> : vector<8xf32>
    %106 = vector.multi_reduction <add>, %105, %cst_31 [1] : vector<8x32xf32> to vector<8xf32>
    %107 = vector.shape_cast %106 : vector<8xf32> to vector<8x1xf32>
    %cst_32 = arith.constant 3.200000e+01 : f32
    %108 = vector.broadcast %cst_32 : f32 to vector<8x1xf32>
    %109 = arith.divf %107, %108 : vector<8x1xf32>
    %cst_33 = arith.constant 9.99999997E-7 : f32
    %110 = vector.broadcast %cst_33 : f32 to vector<8x1xf32>
    %111 = arith.addf %109, %110 : vector<8x1xf32>
    %112 = math.rsqrt %111 : vector<8x1xf32>
    %113 = vector.broadcast %112 : vector<8x1xf32> to vector<8x32xf32>
    %114 = arith.mulf %102, %113 : vector<8x32xf32>
    %115 = vector.broadcast %104 : vector<1x32xf32> to vector<8x32xf32>
    %116 = arith.mulf %115, %114 : vector<8x32xf32>
    %117 = arith.truncf %116 : vector<8x32xf32> to vector<8x32xbf16>
    %c0_34 = arith.constant 0 : index
    %c0_35 = arith.constant 0 : index
    %c0_36 = arith.constant 0 : index
    %118 = vector.load %arg7[%c0_34, %c0_35, %c0_36] : memref<2x32x128xbf16, #tpu.memory_space<vmem>>, vector<1x32x128xbf16>
    %119 = vector.shape_cast %118 : vector<1x32x128xbf16> to vector<32x128xbf16>
    %cst_37 = arith.constant dense<0.000000e+00> : vector<8x128xf32>
    %120 = tpu.matmul %117, %119, %cst_37 {dimension_numbers = #tpu.dot_dimension_numbers<[1], [0], [0], [1], [0, 0, 1, 1], [], []>} : vector<8x32xbf16>, vector<32x128xbf16>, vector<8x128xf32> -> vector<8x128xf32>
    %121 = vector.extract_strided_slice %120 {offsets = [0, 0], sizes = [8, 64], strides = [1, 1]} : vector<8x128xf32> to vector<8x64xf32>
    %122 = vector.extract_strided_slice %120 {offsets = [0, 64], sizes = [8, 64], strides = [1, 1]} : vector<8x128xf32> to vector<8x64xf32>
    %123 = arith.negf %121 : vector<8x64xf32>
    %124 = math.exp %123 : vector<8x64xf32>
    %cst_38 = arith.constant 1.000000e+00 : f32
    %125 = vector.broadcast %cst_38 : f32 to vector<8x64xf32>
    %126 = arith.addf %125, %124 : vector<8x64xf32>
    %127 = arith.divf %125, %126 : vector<8x64xf32>
    %128 = arith.mulf %121, %127 : vector<8x64xf32>
    %129 = arith.mulf %128, %122 : vector<8x64xf32>
    %130 = arith.truncf %129 : vector<8x64xf32> to vector<8x64xbf16>
    %c0_39 = arith.constant 0 : index
    %c0_40 = arith.constant 0 : index
    %c0_41 = arith.constant 0 : index
    %131 = vector.load %arg8[%c0_39, %c0_40, %c0_41] : memref<2x64x32xbf16, #tpu.memory_space<vmem>>, vector<1x64x32xbf16>
    %132 = vector.shape_cast %131 : vector<1x64x32xbf16> to vector<64x32xbf16>
    %cst_42 = arith.constant dense<0.000000e+00> : vector<8x32xf32>
    %133 = tpu.matmul %130, %132, %cst_42 {dimension_numbers = #tpu.dot_dimension_numbers<[1], [0], [0], [1], [0, 0, 1, 1], [], []>} : vector<8x64xbf16>, vector<64x32xbf16>, vector<8x32xf32> -> vector<8x32xf32>
    %134 = arith.addf %102, %133 : vector<8x32xf32>
    %c1 = arith.constant 1 : index
    %c0_43 = arith.constant 0 : index
    %c0_44 = arith.constant 0 : index
    %135 = vector.load %arg3[%c1, %c0_43, %c0_44] : memref<2x1x32xf32, #tpu.memory_space<vmem>>, vector<1x1x32xf32>
    %136 = vector.shape_cast %135 : vector<1x1x32xf32> to vector<1x32xf32>
    %137 = arith.mulf %134, %134 : vector<8x32xf32>
    %cst_45 = arith.constant dense<0.000000e+00> : vector<8xf32>
    %138 = vector.multi_reduction <add>, %137, %cst_45 [1] : vector<8x32xf32> to vector<8xf32>
    %139 = vector.shape_cast %138 : vector<8xf32> to vector<8x1xf32>
    %cst_46 = arith.constant 3.200000e+01 : f32
    %140 = vector.broadcast %cst_46 : f32 to vector<8x1xf32>
    %141 = arith.divf %139, %140 : vector<8x1xf32>
    %cst_47 = arith.constant 9.99999997E-7 : f32
    %142 = vector.broadcast %cst_47 : f32 to vector<8x1xf32>
    %143 = arith.addf %141, %142 : vector<8x1xf32>
    %144 = math.rsqrt %143 : vector<8x1xf32>
    %145 = vector.broadcast %144 : vector<8x1xf32> to vector<8x32xf32>
    %146 = arith.mulf %134, %145 : vector<8x32xf32>
    %147 = vector.broadcast %136 : vector<1x32xf32> to vector<8x32xf32>
    %148 = arith.mulf %147, %146 : vector<8x32xf32>
    %149 = arith.truncf %148 : vector<8x32xf32> to vector<8x32xbf16>
    %c1_48 = arith.constant 1 : index
    %c0_49 = arith.constant 0 : index
    %c0_50 = arith.constant 0 : index
    %150 = vector.load %arg4[%c1_48, %c0_49, %c0_50] : memref<2x32x160xbf16, #tpu.memory_space<vmem>>, vector<1x32x160xbf16>
    %151 = vector.shape_cast %150 : vector<1x32x160xbf16> to vector<32x160xbf16>
    %cst_51 = arith.constant dense<0.000000e+00> : vector<8x160xf32>
    %152 = tpu.matmul %149, %151, %cst_51 {dimension_numbers = #tpu.dot_dimension_numbers<[1], [0], [0], [1], [0, 0, 1, 1], [], []>} : vector<8x32xbf16>, vector<32x160xbf16>, vector<8x160xf32> -> vector<8x160xf32>
    %153 = vector.extract_strided_slice %152 {offsets = [0, 0], sizes = [8, 32], strides = [1, 1]} : vector<8x160xf32> to vector<8x32xf32>
    %154 = arith.mulf %153, %9 : vector<8x32xf32>
    %155 = vector.extract_strided_slice %152 {offsets = [0, 32], sizes = [8, 32], strides = [1, 1]} : vector<8x160xf32> to vector<8x32xf32>
    %156 = arith.mulf %155, %10 : vector<8x32xf32>
    %157 = arith.addf %154, %156 : vector<8x32xf32>
    %158 = vector.extract_strided_slice %152 {offsets = [0, 64], sizes = [8, 32], strides = [1, 1]} : vector<8x160xf32> to vector<8x32xf32>
    %159 = arith.mulf %158, %9 : vector<8x32xf32>
    %160 = vector.extract_strided_slice %152 {offsets = [0, 96], sizes = [8, 32], strides = [1, 1]} : vector<8x160xf32> to vector<8x32xf32>
    %161 = arith.mulf %160, %10 : vector<8x32xf32>
    %162 = arith.addf %159, %161 : vector<8x32xf32>
    %163 = vector.extract_strided_slice %152 {offsets = [0, 128], sizes = [8, 32], strides = [1, 1]} : vector<8x160xf32> to vector<8x32xf32>
    %164 = vector.extract_strided_slice %157 {offsets = [0, 0], sizes = [8, 8], strides = [1, 1]} : vector<8x32xf32> to vector<8x8xf32>
    %165 = vector.extract_strided_slice %157 {offsets = [0, 8], sizes = [8, 8], strides = [1, 1]} : vector<8x32xf32> to vector<8x8xf32>
    %166 = vector.extract_strided_slice %157 {offsets = [0, 16], sizes = [8, 8], strides = [1, 1]} : vector<8x32xf32> to vector<8x8xf32>
    %167 = vector.extract_strided_slice %157 {offsets = [0, 24], sizes = [8, 8], strides = [1, 1]} : vector<8x32xf32> to vector<8x8xf32>
    %168 = vector.shape_cast %164 : vector<8x8xf32> to vector<1x8x8xf32>
    %169 = vector.shape_cast %165 : vector<8x8xf32> to vector<1x8x8xf32>
    %170 = vector.shape_cast %166 : vector<8x8xf32> to vector<1x8x8xf32>
    %171 = vector.shape_cast %167 : vector<8x8xf32> to vector<1x8x8xf32>
    %172 = tpu.concatenate %168, %169, %170, %171 in 0 : vector<1x8x8xf32>, vector<1x8x8xf32>, vector<1x8x8xf32>, vector<1x8x8xf32> -> vector<4x8x8xf32>
    %173 = arith.truncf %172 : vector<4x8x8xf32> to vector<4x8x8xbf16>
    %174 = vector.extract_strided_slice %162 {offsets = [0, 0], sizes = [8, 8], strides = [1, 1]} : vector<8x32xf32> to vector<8x8xf32>
    %175 = vector.extract_strided_slice %162 {offsets = [0, 8], sizes = [8, 8], strides = [1, 1]} : vector<8x32xf32> to vector<8x8xf32>
    %176 = vector.extract_strided_slice %162 {offsets = [0, 16], sizes = [8, 8], strides = [1, 1]} : vector<8x32xf32> to vector<8x8xf32>
    %177 = vector.extract_strided_slice %162 {offsets = [0, 24], sizes = [8, 8], strides = [1, 1]} : vector<8x32xf32> to vector<8x8xf32>
    %178 = vector.shape_cast %174 : vector<8x8xf32> to vector<1x8x8xf32>
    %179 = vector.shape_cast %175 : vector<8x8xf32> to vector<1x8x8xf32>
    %180 = vector.shape_cast %176 : vector<8x8xf32> to vector<1x8x8xf32>
    %181 = vector.shape_cast %177 : vector<8x8xf32> to vector<1x8x8xf32>
    %182 = tpu.concatenate %178, %179, %180, %181 in 0 : vector<1x8x8xf32>, vector<1x8x8xf32>, vector<1x8x8xf32>, vector<1x8x8xf32> -> vector<4x8x8xf32>
    %183 = arith.truncf %182 : vector<4x8x8xf32> to vector<4x8x8xbf16>
    %184 = vector.extract_strided_slice %163 {offsets = [0, 0], sizes = [8, 8], strides = [1, 1]} : vector<8x32xf32> to vector<8x8xf32>
    %185 = vector.extract_strided_slice %163 {offsets = [0, 8], sizes = [8, 8], strides = [1, 1]} : vector<8x32xf32> to vector<8x8xf32>
    %186 = vector.extract_strided_slice %163 {offsets = [0, 16], sizes = [8, 8], strides = [1, 1]} : vector<8x32xf32> to vector<8x8xf32>
    %187 = vector.extract_strided_slice %163 {offsets = [0, 24], sizes = [8, 8], strides = [1, 1]} : vector<8x32xf32> to vector<8x8xf32>
    %188 = vector.shape_cast %184 : vector<8x8xf32> to vector<1x8x8xf32>
    %189 = vector.shape_cast %185 : vector<8x8xf32> to vector<1x8x8xf32>
    %190 = vector.shape_cast %186 : vector<8x8xf32> to vector<1x8x8xf32>
    %191 = vector.shape_cast %187 : vector<8x8xf32> to vector<1x8x8xf32>
    %192 = tpu.concatenate %188, %189, %190, %191 in 0 : vector<1x8x8xf32>, vector<1x8x8xf32>, vector<1x8x8xf32>, vector<1x8x8xf32> -> vector<4x8x8xf32>
    %193 = arith.truncf %192 : vector<4x8x8xf32> to vector<4x8x8xbf16>
    "tpu.trace_start"() <{level = 10 : i32, message = "hqd,hkd->hqk"}> : () -> ()
    %cst_52 = arith.constant dense<0.000000e+00> : vector<4x8x8xf32>
    %194 = tpu.matmul %173, %183, %cst_52 {dimension_numbers = #tpu.dot_dimension_numbers<[2], [2], [1], [1], [0, 0, 0, 1, 1, 1], [0], [0]>} : vector<4x8x8xbf16>, vector<4x8x8xbf16>, vector<4x8x8xf32> -> vector<4x8x8xf32>
    "tpu.trace_stop"() : () -> ()
    %cst_53 = arith.constant 0.353553385 : f32
    %195 = vector.broadcast %cst_53 : f32 to vector<4x8x8xf32>
    %196 = arith.mulf %194, %195 : vector<4x8x8xf32>
    %cst_54 = arith.constant -1.000000e+30 : f32
    %197 = vector.broadcast %cst_54 : f32 to vector<4x8x8xf32>
    %198 = arith.select %13, %196, %197 : vector<4x8x8xi1>, vector<4x8x8xf32>
    %cst_55 = arith.constant dense<0xFF800000> : vector<4x8xf32>
    %199 = vector.multi_reduction <maximumf>, %198, %cst_55 [2] : vector<4x8x8xf32> to vector<4x8xf32>
    %200 = vector.shape_cast %199 : vector<4x8xf32> to vector<4x8x1xf32>
    %201 = vector.broadcast %200 : vector<4x8x1xf32> to vector<4x8x8xf32>
    %202 = arith.subf %198, %201 : vector<4x8x8xf32>
    %203 = math.exp %202 : vector<4x8x8xf32>
    %cst_56 = arith.constant dense<0.000000e+00> : vector<4x8xf32>
    %204 = vector.multi_reduction <add>, %203, %cst_56 [2] : vector<4x8x8xf32> to vector<4x8xf32>
    %205 = vector.shape_cast %204 : vector<4x8xf32> to vector<4x8x1xf32>
    %206 = vector.broadcast %205 : vector<4x8x1xf32> to vector<4x8x8xf32>
    %207 = arith.divf %203, %206 : vector<4x8x8xf32>
    %208 = arith.truncf %207 : vector<4x8x8xf32> to vector<4x8x8xbf16>
    "tpu.trace_start"() <{level = 10 : i32, message = "hqk,hkd->hqd"}> : () -> ()
    %cst_57 = arith.constant dense<0.000000e+00> : vector<4x8x8xf32>
    %209 = tpu.matmul %208, %193, %cst_57 {dimension_numbers = #tpu.dot_dimension_numbers<[2], [1], [1], [2], [0, 0, 0, 1, 1, 2], [0], [0]>} : vector<4x8x8xbf16>, vector<4x8x8xbf16>, vector<4x8x8xf32> -> vector<4x8x8xf32>
    "tpu.trace_stop"() : () -> ()
    %210 = vector.extract_strided_slice %209 {offsets = [0, 0, 0], sizes = [1, 8, 8], strides = [1, 1, 1]} : vector<4x8x8xf32> to vector<1x8x8xf32>
    %211 = vector.shape_cast %210 : vector<1x8x8xf32> to vector<8x8xf32>
    %212 = vector.extract_strided_slice %209 {offsets = [1, 0, 0], sizes = [1, 8, 8], strides = [1, 1, 1]} : vector<4x8x8xf32> to vector<1x8x8xf32>
    %213 = vector.shape_cast %212 : vector<1x8x8xf32> to vector<8x8xf32>
    %214 = vector.extract_strided_slice %209 {offsets = [2, 0, 0], sizes = [1, 8, 8], strides = [1, 1, 1]} : vector<4x8x8xf32> to vector<1x8x8xf32>
    %215 = vector.shape_cast %214 : vector<1x8x8xf32> to vector<8x8xf32>
    %216 = vector.extract_strided_slice %209 {offsets = [3, 0, 0], sizes = [1, 8, 8], strides = [1, 1, 1]} : vector<4x8x8xf32> to vector<1x8x8xf32>
    %217 = vector.shape_cast %216 : vector<1x8x8xf32> to vector<8x8xf32>
    %218 = tpu.concatenate %211, %213, %215, %217 in 1 : vector<8x8xf32>, vector<8x8xf32>, vector<8x8xf32>, vector<8x8xf32> -> vector<8x32xf32>
    %219 = arith.truncf %218 : vector<8x32xf32> to vector<8x32xbf16>
    %c1_58 = arith.constant 1 : index
    %c0_59 = arith.constant 0 : index
    %c0_60 = arith.constant 0 : index
    %220 = vector.load %arg5[%c1_58, %c0_59, %c0_60] : memref<2x32x32xbf16, #tpu.memory_space<vmem>>, vector<1x32x32xbf16>
    %221 = vector.shape_cast %220 : vector<1x32x32xbf16> to vector<32x32xbf16>
    %cst_61 = arith.constant dense<0.000000e+00> : vector<8x32xf32>
    %222 = tpu.matmul %219, %221, %cst_61 {dimension_numbers = #tpu.dot_dimension_numbers<[1], [0], [0], [1], [0, 0, 1, 1], [], []>} : vector<8x32xbf16>, vector<32x32xbf16>, vector<8x32xf32> -> vector<8x32xf32>
    %223 = arith.addf %134, %222 : vector<8x32xf32>
    %c1_62 = arith.constant 1 : index
    %c0_63 = arith.constant 0 : index
    %c0_64 = arith.constant 0 : index
    %224 = vector.load %arg6[%c1_62, %c0_63, %c0_64] : memref<2x1x32xf32, #tpu.memory_space<vmem>>, vector<1x1x32xf32>
    %225 = vector.shape_cast %224 : vector<1x1x32xf32> to vector<1x32xf32>
    %226 = arith.mulf %223, %223 : vector<8x32xf32>
    %cst_65 = arith.constant dense<0.000000e+00> : vector<8xf32>
    %227 = vector.multi_reduction <add>, %226, %cst_65 [1] : vector<8x32xf32> to vector<8xf32>
    %228 = vector.shape_cast %227 : vector<8xf32> to vector<8x1xf32>
    %cst_66 = arith.constant 3.200000e+01 : f32
    %229 = vector.broadcast %cst_66 : f32 to vector<8x1xf32>
    %230 = arith.divf %228, %229 : vector<8x1xf32>
    %cst_67 = arith.constant 9.99999997E-7 : f32
    %231 = vector.broadcast %cst_67 : f32 to vector<8x1xf32>
    %232 = arith.addf %230, %231 : vector<8x1xf32>
    %233 = math.rsqrt %232 : vector<8x1xf32>
    %234 = vector.broadcast %233 : vector<8x1xf32> to vector<8x32xf32>
    %235 = arith.mulf %223, %234 : vector<8x32xf32>
    %236 = vector.broadcast %225 : vector<1x32xf32> to vector<8x32xf32>
    %237 = arith.mulf %236, %235 : vector<8x32xf32>
    %238 = arith.truncf %237 : vector<8x32xf32> to vector<8x32xbf16>
    %c1_68 = arith.constant 1 : index
    %c0_69 = arith.constant 0 : index
    %c0_70 = arith.constant 0 : index
    %239 = vector.load %arg7[%c1_68, %c0_69, %c0_70] : memref<2x32x128xbf16, #tpu.memory_space<vmem>>, vector<1x32x128xbf16>
    %240 = vector.shape_cast %239 : vector<1x32x128xbf16> to vector<32x128xbf16>
    %cst_71 = arith.constant dense<0.000000e+00> : vector<8x128xf32>
    %241 = tpu.matmul %238, %240, %cst_71 {dimension_numbers = #tpu.dot_dimension_numbers<[1], [0], [0], [1], [0, 0, 1, 1], [], []>} : vector<8x32xbf16>, vector<32x128xbf16>, vector<8x128xf32> -> vector<8x128xf32>
    %242 = vector.extract_strided_slice %241 {offsets = [0, 0], sizes = [8, 64], strides = [1, 1]} : vector<8x128xf32> to vector<8x64xf32>
    %243 = vector.extract_strided_slice %241 {offsets = [0, 64], sizes = [8, 64], strides = [1, 1]} : vector<8x128xf32> to vector<8x64xf32>
    %244 = arith.negf %242 : vector<8x64xf32>
    %245 = math.exp %244 : vector<8x64xf32>
    %cst_72 = arith.constant 1.000000e+00 : f32
    %246 = vector.broadcast %cst_72 : f32 to vector<8x64xf32>
    %247 = arith.addf %246, %245 : vector<8x64xf32>
    %248 = arith.divf %246, %247 : vector<8x64xf32>
    %249 = arith.mulf %242, %248 : vector<8x64xf32>
    %250 = arith.mulf %249, %243 : vector<8x64xf32>
    %251 = arith.truncf %250 : vector<8x64xf32> to vector<8x64xbf16>
    %c1_73 = arith.constant 1 : index
    %c0_74 = arith.constant 0 : index
    %c0_75 = arith.constant 0 : index
    %252 = vector.load %arg8[%c1_73, %c0_74, %c0_75] : memref<2x64x32xbf16, #tpu.memory_space<vmem>>, vector<1x64x32xbf16>
    %253 = vector.shape_cast %252 : vector<1x64x32xbf16> to vector<64x32xbf16>
    %cst_76 = arith.constant dense<0.000000e+00> : vector<8x32xf32>
    %254 = tpu.matmul %251, %253, %cst_76 {dimension_numbers = #tpu.dot_dimension_numbers<[1], [0], [0], [1], [0, 0, 1, 1], [], []>} : vector<8x64xbf16>, vector<64x32xbf16>, vector<8x32xf32> -> vector<8x32xf32>
    %255 = arith.addf %223, %254 : vector<8x32xf32>
    %c0_77 = arith.constant 0 : index
    %c0_78 = arith.constant 0 : index
    %256 = vector.load %arg9[%c0_77, %c0_78] : memref<1x32xf32, #tpu.memory_space<vmem>>, vector<1x32xf32>
    %257 = arith.mulf %255, %255 : vector<8x32xf32>
    %cst_79 = arith.constant dense<0.000000e+00> : vector<8xf32>
    %258 = vector.multi_reduction <add>, %257, %cst_79 [1] : vector<8x32xf32> to vector<8xf32>
    %259 = vector.shape_cast %258 : vector<8xf32> to vector<8x1xf32>
    %cst_80 = arith.constant 3.200000e+01 : f32
    %260 = vector.broadcast %cst_80 : f32 to vector<8x1xf32>
    %261 = arith.divf %259, %260 : vector<8x1xf32>
    %cst_81 = arith.constant 9.99999997E-7 : f32
    %262 = vector.broadcast %cst_81 : f32 to vector<8x1xf32>
    %263 = arith.addf %261, %262 : vector<8x1xf32>
    %264 = math.rsqrt %263 : vector<8x1xf32>
    %265 = vector.broadcast %264 : vector<8x1xf32> to vector<8x32xf32>
    %266 = arith.mulf %255, %265 : vector<8x32xf32>
    %267 = vector.broadcast %256 : vector<1x32xf32> to vector<8x32xf32>
    %268 = arith.mulf %267, %266 : vector<8x32xf32>
    %c0_82 = arith.constant 0 : index
    %c0_83 = arith.constant 0 : index
    %c0_84 = arith.constant 0 : index
    %269 = vector.load %arg12[%c0_82, %c0_83, %c0_84] : memref<1x8x32xf32, #tpu.memory_space<vmem>>, vector<1x8x32xf32>
    %270 = vector.shape_cast %269 : vector<1x8x32xf32> to vector<8x32xf32>
    %271 = vector.shape_cast %268 : vector<8x32xf32> to vector<1x8x32xf32>
    tpu.vector_store %arg12[%c0_82, %c0_83, %c0_84], %271 {strides = array<i32>} : memref<1x8x32xf32, #tpu.memory_space<vmem>>, vector<1x8x32xf32>,
    return
  }
  func.func @transform_0(%arg0: i32) -> (i32, i32, i32) {
    %c0_i32 = arith.constant 0 : i32
    %c0_i32_0 = arith.constant 0 : i32
    %c0_i32_1 = arith.constant 0 : i32
    return %arg0, %c0_i32, %c0_i32_0 : i32, i32, i32
  }
  func.func @transform_1(%arg0: i32) -> (i32, i32) {
    %c0_i32 = arith.constant 0 : i32
    %c0_i32_0 = arith.constant 0 : i32
    %c0_i32_1 = arith.constant 0 : i32
    return %c0_i32, %c0_i32_0 : i32, i32
  }
  func.func @transform_2(%arg0: i32) -> (i32, i32, i32) {
    %c0_i32 = arith.constant 0 : i32
    %c0_i32_0 = arith.constant 0 : i32
    %c0_i32_1 = arith.constant 0 : i32
    %c0_i32_2 = arith.constant 0 : i32
    return %c0_i32, %c0_i32_0, %c0_i32_1 : i32, i32, i32
  }
  func.func @transform_3(%arg0: i32) -> (i32, i32, i32) {
    %c0_i32 = arith.constant 0 : i32
    %c0_i32_0 = arith.constant 0 : i32
    %c0_i32_1 = arith.constant 0 : i32
    %c0_i32_2 = arith.constant 0 : i32
    return %c0_i32, %c0_i32_0, %c0_i32_1 : i32, i32, i32
  }
  func.func @transform_4(%arg0: i32) -> (i32, i32, i32) {
    %c0_i32 = arith.constant 0 : i32
    %c0_i32_0 = arith.constant 0 : i32
    %c0_i32_1 = arith.constant 0 : i32
    %c0_i32_2 = arith.constant 0 : i32
    return %c0_i32, %c0_i32_0, %c0_i32_1 : i32, i32, i32
  }
  func.func @transform_5(%arg0: i32) -> (i32, i32, i32) {
    %c0_i32 = arith.constant 0 : i32
    %c0_i32_0 = arith.constant 0 : i32
    %c0_i32_1 = arith.constant 0 : i32
    %c0_i32_2 = arith.constant 0 : i32
    return %c0_i32, %c0_i32_0, %c0_i32_1 : i32, i32, i32
  }
  func.func @transform_6(%arg0: i32) -> (i32, i32, i32) {
    %c0_i32 = arith.constant 0 : i32
    %c0_i32_0 = arith.constant 0 : i32
    %c0_i32_1 = arith.constant 0 : i32
    %c0_i32_2 = arith.constant 0 : i32
    return %c0_i32, %c0_i32_0, %c0_i32_1 : i32, i32, i32
  }
  func.func @transform_7(%arg0: i32) -> (i32, i32, i32) {
    %c0_i32 = arith.constant 0 : i32
    %c0_i32_0 = arith.constant 0 : i32
    %c0_i32_1 = arith.constant 0 : i32
    %c0_i32_2 = arith.constant 0 : i32
    return %c0_i32, %c0_i32_0, %c0_i32_1 : i32, i32, i32
  }
  func.func @transform_8(%arg0: i32) -> (i32, i32) {
    %c0_i32 = arith.constant 0 : i32
    %c0_i32_0 = arith.constant 0 : i32
    %c0_i32_1 = arith.constant 0 : i32
    return %c0_i32, %c0_i32_0 : i32, i32
  }
  func.func @transform_9(%arg0: i32) -> (i32, i32) {
    %c0_i32 = arith.constant 0 : i32
    %c0_i32_0 = arith.constant 0 : i32
    %c0_i32_1 = arith.constant 0 : i32
    return %c0_i32, %c0_i32_0 : i32, i32
  }
  func.func @transform_10(%arg0: i32) -> (i32, i32) {
    %c0_i32 = arith.constant 0 : i32
    %c0_i32_0 = arith.constant 0 : i32
    %c0_i32_1 = arith.constant 0 : i32
    return %c0_i32, %c0_i32_0 : i32, i32
  }
  func.func @transform_11(%arg0: i32) -> (i32, i32, i32) {
    %c0_i32 = arith.constant 0 : i32
    %c0_i32_0 = arith.constant 0 : i32
    %c0_i32_1 = arith.constant 0 : i32
    return %arg0, %c0_i32, %c0_i32_0 : i32, i32, i32
  }
}

</mosaic_0001>

<bundles_post_ra>
// kernel: tile.11
= control target key start
LH: loop header
LB: loop body
LE: loop exit
PB: predicated region body
PF: predicated region fallthrough
CT: control target
= control target key end

     0   :  { %vm43_vm0 = vcmask 1047556   ;;  %vm45_vm1 = vcmask 64512   ;;  %s94_s22 = smov 8   ;;  %s95_s25 = smov 16   ;;  %vm55_vm2 = vcmask 261312   ;;  %vm65_vm3 = vcmask 195712   ;;  %s147_s0 = inlined_call_operand.vmem [shape: f32[8,4,8], index: 0, kind: input, shape index: {}]   ;;  %s148_s1 = inlined_call_operand.vmem [shape: f32[8,32], index: 1, kind: output, shape index: {}]  }
   0x1   :  { %v83_v0 = vld [vmem:[%s147_s0 + $0x1c] sm:$0xf]  ;;  %v84_v1 = vld [vmem:[%s147_s0 + $0x18] sm:$0xf]  ;;  %v85_v2 = vld [vmem:[%s147_s0 + $0x14] sm:$0xf] }
   0x2   :  { %9 = vst [vmem:[#allocation0 + $0x38] sm:$0xf] %v83_v0  ;;  %14 = vst [vmem:[#allocation0 + $0x30] sm:$0xf] %v84_v1  ;;  %v86_v3 = vld [vmem:[%s147_s0 + $0x10] sm:$0xf] }
   0x3   :  { %19 = vst [vmem:[#allocation0 + $0x28] sm:$0xf] %v85_v2  ;;  %v87_v4 = vld [vmem:[%s147_s0 + $0xc] sm:$0xf]  ;;  %v88_v5 = vld [vmem:[%s147_s0 + $0x8] sm:$0xf] }
   0x4   :  { %24 = vst [vmem:[#allocation0 + $0x20] sm:$0xf] %v86_v3  ;;  %29 = vst [vmem:[#allocation0 + $0x18] sm:$0xf] %v87_v4  ;;  %v89_v6 = vld [vmem:[%s147_s0 + $0x4] sm:$0xf] }
   0x5   :  { %34 = vst [vmem:[#allocation0 + $0x10] sm:$0xf] %v88_v5  ;;  %v39_v7 = vld [vmem:[%s147_s0] sm:$0xf]  ;;  %38 = vst [vmem:[#allocation0 + $0x8] sm:$0xf] %v89_v6 }
   0x6   :  { %40 = vst [vmem:[#allocation0] sm:$0xf] %v39_v7  ;;  %s93_s0 = smov 24   ;;  %vm75_vm4 = vcmask 130112  }
   0xb   :  { %v50_v8 = vld [vmem:[#allocation0 + $0x3] ss:$8 sm:$0xf0]   ;;  %v60_v9 = vld [vmem:[#allocation0 + $0x2] ss:$8 sm:$0xf0]  }
   0xc   :  { %v70_v14 = vld [vmem:[#allocation0 + $0x1] ss:$8 sm:$0xf0]   ;;  %v42_v17 = vld [vmem:[#allocation0] ss:$8 sm:$0xf0]  }
   0xd   :  { %v48_v10 = vld [vmem:[#allocation0 + $0x3] ss:$8 sm:$0xf]   ;;  %v58_v11 = vld [vmem:[#allocation0 + $0x2] ss:$8 sm:$0xf]  }
   0xe   :  { %v52_v12 = vsel %vm43_vm0, %v50_v8, %v48_v10  ;;  %v68_v13 = vld [vmem:[#allocation0 + $0x1] ss:$8 sm:$0xf]   ;;  %v41_v16 = vld [vmem:[#allocation0] ss:$8 sm:$0xf]   ;;  %v62_v18 = vsel %vm43_vm0, %v60_v9, %v58_v11 }
   0xf   :  { %53 = vrot.lane.b32.xlu0 %v52_v12, %s93_s0  ;;  %v72_v15 = vsel %vm43_vm0, %v70_v14, %v68_v13  ;;  %v44_v19 = vsel %vm43_vm0, %v42_v17, %v41_v16 }
  0x10   :  { %73 = vrot.lane.b32.xlu1 %v72_v15, %s94_s22  ;;  %46 = vst.msk [vmem:[%s148_s1] sm:$0xff] %vm45_vm1, %v44_v19  }
  0x13   :  { %63 = vrot.lane.b32.xlu0 %v62_v18, %s95_s25 }
  0x81   :  { %v54_v20 = vpop.permute.xlu0 %53  }
  0x82   :  { %56 = vst.msk [vmem:[%s148_s1] sm:$0xff] %vm55_vm2, %v54_v20   ;;  %v74_v21 = vpop.permute.xlu1 %73  }
  0x85   :  { %v64_v22 = vpop.permute.xlu0 %63  }
  0x86   :  { %66 = vst.msk [vmem:[%s148_s1] sm:$0xff] %vm65_vm3, %v64_v22  }
  0x87   :  { %76 = vst.msk [vmem:[%s148_s1] sm:$0xff] %vm75_vm4, %v74_v21  }

// kernel: llama_model.1
= control target key start
LH: loop header
LB: loop body
LE: loop exit
PB: predicated region body
PF: predicated region fallthrough
CT: control target
= control target key end

     0   :  { %s3288_s0 = inlined_call_operand.vmem [shape: s32[2,8,1], index: 0, kind: input, shape index: {}]   ;;  %s3289_s1 = inlined_call_operand.vmem [shape: f32[64,32], index: 1, kind: input, shape index: {}]   ;;  %s3290_s2 = inlined_call_operand.vmem [shape: f32[2,1,32], index: 2, kind: input, shape index: {}]   ;;  %s3291_s3 = inlined_call_operand.vmem [shape: bf16[2,32,160], index: 3, kind: input, shape index: {}]   ;;  %s3292_s4 = inlined_call_operand.vmem [shape: bf16[2,32,32], index: 4, kind: input, shape index: {}]   ;;  %s3293_s5 = inlined_call_operand.vmem [shape: f32[2,1,32], index: 5, kind: input, shape index: {}]   ;;  %s3294_s6 = inlined_call_operand.vmem [shape: bf16[2,32,128], index: 6, kind: input, shape index: {}]   ;;  %s3295_s7 = inlined_call_operand.vmem [shape: bf16[2,64,32], index: 7, kind: input, shape index: {}]   ;;  %s3296_s8 = inlined_call_operand.vmem [shape: f32[1,32], index: 8, kind: input, shape index: {}]   ;;  %s3297_s9 = inlined_call_operand.vmem [shape: f32[8,32], index: 9, kind: input, shape index: {}]   ;;  %s3298_s10 = inlined_call_operand.vmem [shape: f32[8,32], index: 10, kind: input, shape index: {}]   ;;  %s3299_s11 = inlined_call_operand.hbm [shape: f32[2,8,32], index: 11, kind: output, shape index: {}]  }
   0x1   :  { %3307 = sst [smem:[#allocation6_spill]] %s3288_s0 }
   0x2   :  { %16 = vsyncpa [#allocation3], 0 }
   0x3   :  { %18 = vsyncpa [#allocation3 + $0x1], 0  ;;  %s2816_s17 = smov 0   ;;  %s2818_s18 = smov 0  }
   0x4   :  { %s2820_s19 = smov 0   ;;  %s2822_s20 = smov 0  }
   0x5 LB: > { %s2837_s21 = sadd.s32 4294967295, %s2741_s20   ;;  %s2228_s22 = sadd.s32 4294967294, %s2741_s20   ;;  %s2741_s20 = sphi %s2822_s20, %s3323_s20   ;;  %s2737_s19 = sphi %s2820_s19, %s3322_s19   ;;  %s2733_s18 = sphi %s2818_s18, %s3321_s18   ;;  %s2729_s17 = sphi %s2816_s17, %s3320_s17  }
   0x6   : > { %s2841_s23 = sadd.s32 1, %s2741_s20   ;;  %s267_s24 = sadd.s32 1, %s2737_s19 }
   0x7   : > { %s264_s25 = ssub.s32 %s2741_s20, %s2841_s23  ;;  %p277_p0 = scmp.ne.s32.totalorder %s2737_s19, %s2733_s18 }
   0x8   : > { %p265_p1 = scmp.eq.s32.totalorder %s264_s25, 0  ;;  %p278_p2 = scmp.eq.s32.totalorder %s2837_s21, 1 }
   0x9   : > { %p283_p3 = scmp.ne.s32.totalorder %s2733_s18, %s2729_s17  ;;  %p284_p4 = scmp.eq.s32.totalorder %s2228_s22, 1 }
   0xa   : > { %s2852_s26 = scalar_select %p265_p1, %s2737_s19, %s267_s24  }
   0xb   : > { %p2854_p5 = por %p278_p2, %p277_p0  ;;  %p2858_p6 = por %p284_p4, %p283_p3 }
   0xc   : > { %3308 = sst [smem:[#allocation5_spill]] %s2852_s26  ;;  %p2231_p7 = scmp.ge.s32.totalorder %s2741_s20, 1 }
   0xd   : > { %p339_p8 = scmp.lt.s32.totalorder %s2741_s20, 3 }
   0xf   : > { %p340_p9 = pnand %p2231_p7, %p339_p8 }
  0x10   : > { %p378_p10 = scmp.lt.s32.totalorder (!%p340_p9), %s2837_s21, 1  ;;  %s3311_s0 = sld [smem:[#allocation6_spill]] (!%p340_p9) }
  0x11   : > { %343 = sbr.rel (%p340_p9) target bundleno = 5400 (0x1518), region = 64  ;;  %s2746_s24 = smov (!%p340_p9), 96  }
  0x12   : > { %s3305_s30 = smov (!%p340_p9), 64   ;;  %s2749_s15 = smov (!%p340_p9), 120  }
  0x13   : > { %s3303_s16 = smov (!%p340_p9), 112   ;;  %s3302_s29 = smov (!%p340_p9), 8  }
  0x14   : > { %s3300_s26 = smov (!%p340_p9), 24   ;;  %s3317_s13 = smov (!%p340_p9), 16  }
  0x16   : > { %v399_v0 = vld [vmem:[%s3289_s1 + $0x38] sm:$0xff]  ;;  %v2743_v1 = vmov 0   ;;  %v2744_v2 = vmov 0.0   ;;  %v398_v3 = vld [vmem:[%s3289_s1 + $0x30] sm:$0xff]  ;;  %s379_s14 = scalar_select %p378_p10, %s2837_s21, 1  ;;  %v397_v4 = vld [vmem:[%s3289_s1 + $0x28] sm:$0xff]  ;;  %v384_v11 = vlaneseq }
  0x17   : > { %2602 = vset.pattern.permute.xlu0 %v2743_v1  ;;  %2380 = vmatprep.subr.mxu0 %v2744_v2  ;;  %v396_v5 = vld [vmem:[%s3289_s1 + $0x20] sm:$0xff]  ;;  %vm2745_vm0 = vmmov 0   ;;  %v395_v6 = vld [vmem:[%s3289_s1 + $0x18] sm:$0xff]  ;;  %v394_v8 = vld [vmem:[%s3289_s1 + $0x10] sm:$0xff]  ;;  %vm400_vm1 = vcmask 523264   ;;  %vm481_vm3 = vcmask 261120  }
  0x18   : > { %2381 = vmatpush3.msra.mxu0 %v399_v0  ;;  %557 = vmatprep.mubr.bf16.mxu1 %v2743_v1  ;;  %s2233_s22 = sshll.u32 %s379_s14, 3  ;;  %v393_v9 = vld [vmem:[%s3289_s1 + $0x8] sm:$0xff]  ;;  %v392_v10 = vld [vmem:[%s3289_s1] sm:$0xff]  ;;  %v2907_v12 = vand.u32 127, %v384_v11  ;;  %v2603_v19 = vld [vmem:[%s3291_s3 + $0x14] ss:$8 sps:$4 sm:$0xff]  }
  0x19   : > { %2382 = vmatprep.subr.mxu0 %v2744_v2  ;;  %2396 = vmatprep.mubr.msk.f32.mxu0 %vm2745_vm0, %v2744_v2  ;;  %s381_s12 = scalar_lea.vmem %s3311_s0, %s2233_s22  ;;  %v2605_v20 = vld [vmem:[%s3291_s3 + $0x10] ss:$8 sps:$4 sm:$0xff]   ;;  %v2606_v21 = vld [vmem:[%s3291_s3 + $0x4] ss:$8 sps:$4 sm:$0xff]   ;;  %v2608_v22 = vld [vmem:[%s3291_s3] ss:$8 sps:$4 sm:$0xff]  }
  0x1a   : > { %2383 = vmatpush3.msra.mxu0 %v398_v3  ;;  %v383_v7 = vld [vmem:[%s381_s12] sm:$0xff]  ;;  %537 = vmatprep.subr.bf16.mxu1 %v2603_v19  ;;  %s2748_s14 = smov 32   ;;  %s2751_s22 = smov 104   ;;  %vm636_vm4 = vcmask 64512   ;;  %vm889_vm5 = vcmask 1043456   ;;  %vm1084_vm7 = vcmask 130048  }
  0x1b   : > { %2384 = vmatprep.subr.mxu0 %v2744_v2  ;;  %387 = vperm.xlu0 %2602, %v383_v7   ;;  %v475_v23 = vld [vmem:[%s3298_s10] sm:$0xff]  ;;  %vm1086_vm8 = vcmask 195584   ;;  %s3315_s12 = smov 64  }
  0x1c   : > { %2385 = vmatpush3.msra.mxu0 %v397_v4  ;;  %538 = vmatpush1.bf16.msra.mxu1 %v2605_v20  ;;  %v2939_v24 = vld [vmem:[%s3297_s9] sm:$0xff] }
  0x1d   : > { %2386 = vmatprep.subr.mxu0 %v2744_v2  ;;  %539 = vmatprep.subr.bf16.mxu1 %v2606_v21  ;;  %v2236_v29 = vld [vmem:[%s3290_s2] ss:$0 sm:$0xff] }
  0x1e   : > { %2387 = vmatpush3.msra.mxu0 %v396_v5  ;;  %582 = vrot.lane.b32.xlu1 %v475_v23, %s2746_s24 }
  0x1f   : > { %2388 = vmatprep.subr.mxu0 %v2744_v2 }
  0x20   : > { %2389 = vmatpush3.msra.mxu0 %v395_v6  ;;  %540 = vmatpush1.bf16.msra.mxu1 %v2608_v22 }
  0x21   : > { %2390 = vmatprep.subr.mxu0 %v2744_v2  ;;  %2399 = vmatprep.subr.bf16.mxu1 %v2744_v2 }
  0x22   : > { %2391 = vmatpush3.msra.mxu0 %v394_v8  ;;  %578 = vrot.lane.b32.xlu1 %v2939_v24, %s3305_s30 }
  0x23   : > { %2392 = vmatprep.subr.mxu0 %v2744_v2 }
  0x24   : > { %2393 = vmatpush3.msra.mxu0 %v393_v9 }
  0x25   : > { %2394 = vmatprep.subr.mxu0 %v2744_v2 }
  0x26   : > { %2395 = vmatpush3.msra.mxu0 %v392_v10  ;;  %v477_v10 = vshrl.u32 %v384_v11, 7 }
  0x27   : > { %2417 = vmatprep.subr.bf16.mxu0 %v2744_v2 }
  0x28   : > { %vm3000_vm6 = vcmp.ge.s32.totalorder %v477_v10, %v2907_v12 }
  0x90   : > { %v2950_v33 = vpop.permute.xlu1 %582 }
  0x94   : > { %v2956_v39 = vpop.permute.xlu1 %578 }
  0x96   : > { %v388_v13 = vpop.permute.xlu0 %387 }
  0x97   : > { %vm389_vm2 = vcmp.eq.s32.totalorder %v2907_v12, %v388_v13 }
  0x98   : > { %v2234_v14 = vsel %vm389_vm2, 1.0, %v2744_v2 }
  0x99   : > { %2397 = vmatmul.mubr.msk.f32.vlgmr.msra.gmra.mxu0 %vm400_vm1, %v2234_v14 }
  0x9a   : > { %2419 = vmatprep.mubr.msk.bf16.mxu0 %vm2745_vm0, %v2744_v2 }
 0x159   : > { %v2914_v15 = vpop.f32.mrf.mxu0 }
 0x15a   : > { %v480_v16 = vmul.f32 %v2914_v15, %v2914_v15 }
 0x15b   : > { %v2398_v17 = vpop.f32.mrf.mxu0 }
 0x15c   : > { %v482_v18 = vsel %vm481_vm3, %v480_v16, 0.0 }
 0x15d   : > { %483 = vadd.xlane.f32.xlu0 %v482_v18 }
 0x1e6   : > { %v484_v25 = vpop.xlane.xlu0 %483 }
 0x1e7   : > { %v486_v26 = vmul.f32 0.03125, %v484_v25 }
 0x1e9   : > { %v487_v27 = vadd.f32 1e-06, %v486_v26 }
 0x1eb   : > { %2631 = vrsqrt.f32 %v487_v27 }
 0x1f8   : > { %v2632_v28 = vpop.eup %2631 }
 0x1f9   : > { %v489_v30 = vmul.f32 %v2632_v28, %v2914_v15 }
 0x1fb   : > { %v496_v31 = vmul.f32 %v2236_v29, %v489_v30 }
 0x1fd   : > { %v497_v32 = vpack.c.bf16 %v496_v31, %v496_v31 }
 0x1ff   : > { %2241 = vmatmul.mubr.msk.bf16.vlgmr.msra.gmra.mxu1 %vm481_vm3, %v497_v32 }
 0x200   : > { %2401 = vmatprep.mubr.msk.bf16.mxu1 %vm2745_vm0, %v2744_v2 }
 0x2bf   : > { %v559_v34 = vpop.f32.mrf.mxu1 }
 0x2c0   : > { %v585_v35 = vmul.f32 %v2950_v33, %v559_v34  ;;  %v581_v40 = vmul.f32 %v2956_v39, %v559_v34  ;;  %v566_v48 = vmul.f32 %v559_v34, %v2939_v24 }
 0x2c1   : > { %v2953_v36 = vpop.f32.mrf.mxu1 }
 0x2c2   : > { %587 = vrot.lane.b32.xlu1 %v585_v35, %s2746_s24  ;;  %v629_v4 = vpack.c.bf16 %v2953_v36, %v2953_v36 }
 0x2c3   : > { %v563_v37 = vpop.f32.mrf.mxu1 }
 0x2c4   : > { %v891_v7 = vsel %vm889_vm5, %v629_v4, 0 }
 0x2c5   : > { %v564_v38 = vpop.f32.mrf.mxu1 }
 0x2c6   : > { %568 = vrot.lane.b32.xlu1 %v475_v23, %s2748_s14  ;;  %s3301_s14 = smov 16  }
 0x334   : > { %v588_v41 = vpop.permute.xlu1 %587 }
 0x335   : > { %v590_v42 = vadd.f32 %v588_v41, %v581_v40 }
 0x337   : > { %606 = vrot.lane.b32.xlu1 %v590_v42, %s2749_s15  ;;  %v615_v45 = vpack.c.bf16 %v590_v42, %v590_v42 }
 0x338   : > { %v2960_v43 = vpop.permute.xlu1 %568 }
 0x339   : > { %v571_v44 = vmul.f32 %v2960_v43, %v559_v34 }
 0x33b   : > { %573 = vrot.lane.b32.xlu1 %v571_v44, %s2746_s24 }
 0x33f   : > { %609 = vrot.lane.b32.xlu1 %v590_v42, %s3303_s16 }
 0x343   : > { %612 = vrot.lane.b32.xlu1 %v590_v42, %s2751_s22 }
 0x347   : > { %634 = vrot.lane.b32.xlu1 %v615_v45, %s3305_s30 }
 0x3a9   : > { %v607_v46 = vpop.permute.xlu1 %606 }
 0x3aa   : > { %v616_v47 = vpack.c.bf16 %v607_v46, %v607_v46 }
 0x3ac   : > { %684 = vrot.lane.b32.xlu0 %v616_v47, %s3305_s30 }
 0x3ad   : > { %v574_v49 = vpop.permute.xlu1 %573 }
 0x3ae   : > { %v576_v50 = vadd.f32 %v574_v49, %v566_v48 }
 0x3b0   : > { %592 = vrot.lane.b32.xlu1 %v576_v50, %s2749_s15  ;;  %v601_v57 = vpack.c.bf16 %v576_v50, %v576_v50 }
 0x3b1   : > { %v610_v51 = vpop.permute.xlu1 %609 }
 0x3b2   : > { %v617_v52 = vpack.c.bf16 %v610_v51, %v610_v51 }
 0x3b4   : > { %733 = vrot.lane.b32.xlu1 %v617_v52, %s3305_s30 }
 0x3b5   : > { %v613_v53 = vpop.permute.xlu1 %612 }
 0x3b6   : > { %v618_v54 = vpack.c.bf16 %v613_v53, %v613_v53 }
 0x3b8   : > { %782 = vrot.lane.b32.xlu1 %v618_v54, %s3305_s30 }
 0x3b9   : > { %v635_v55 = vpop.permute.xlu1 %634 }
 0x3ba   : > { %v641_v56 = vsel %vm636_vm4, %v635_v55, 0 }
 0x3bb   : > { %2400 = vmatpush3.bf16.xpose.msra.mxu1 %v641_v56 }
 0x3bc   : > { %595 = vrot.lane.b32.xlu1 %v576_v50, %s3303_s16  ;;  %2405 = vmatprep.subr.bf16.mxu1 %v2744_v2 }
 0x3c0   : > { %598 = vrot.lane.b32.xlu1 %v576_v50, %s2751_s22 }
 0x3c2   : > { %2402 = vmatmul.mubr.msk.bf16.vlgmr.msra.gmra.mxu1 %vm636_vm4, %v601_v57 }
 0x3c3   : > { %2407 = vmatprep.mubr.msk.bf16.mxu1 %vm2745_vm0, %v2744_v2 }
 0x41e   : > { %v685_v58 = vpop.permute.xlu0 %684 }
 0x41f   : > { %v690_v59 = vsel %vm636_vm4, %v685_v58, 0 }
 0x420   : > { %2406 = vmatpush3.bf16.xpose.msra.mxu1 %v690_v59 }
 0x421   : > { %2411 = vmatprep.subr.bf16.mxu1 %v2744_v2 }
 0x422   : > { %v593_v60 = vpop.permute.xlu1 %592 }
 0x423   : > { %v602_v61 = vpack.c.bf16 %v593_v60, %v593_v60 }
 0x426   : > { %v734_v62 = vpop.permute.xlu1 %733 }
 0x427   : > { %v739_v63 = vsel %vm636_vm4, %v734_v62, 0  ;;  %2408 = vmatmul.mubr.msk.bf16.vlgmr.msra.gmra.mxu1 %vm636_vm4, %v602_v61 }
 0x428   : > { %2412 = vmatpush3.bf16.xpose.msra.mxu1 %v739_v63  ;;  %2413 = vmatprep.mubr.msk.bf16.mxu1 %vm2745_vm0, %v2744_v2 }
 0x429   : > { %2423 = vmatprep.subr.bf16.mxu1 %v2744_v2 }
 0x42a   : > { %v783_v0 = vpop.permute.xlu1 %782 }
 0x42b   : > { %v788_v3 = vsel %vm636_vm4, %v783_v0, 0 }
 0x42c   : > { %2418 = vmatpush3.bf16.xpose.msra.mxu0 %v788_v3 }
 0x42d   : > { %2429 = vmatprep.subr.bf16.mxu0 %v2744_v2 }
 0x42e   : > { %v596_v5 = vpop.permute.xlu1 %595 }
 0x42f   : > { %v603_v6 = vpack.c.bf16 %v596_v5, %v596_v5 }
 0x431   : > { %2414 = vmatmul.mubr.msk.bf16.vlgmr.msra.gmra.mxu1 %vm636_vm4, %v603_v6 }
 0x432   : > { %2424 = vmatpush3.bf16.msra.mxu1 %v891_v7  ;;  %v599_v8 = vpop.permute.xlu1 %598  ;;  %2425 = vmatprep.mubr.msk.bf16.mxu1 %vm2745_vm0, %v2744_v2 }
 0x433   : > { %v604_v9 = vpack.c.bf16 %v599_v8, %v599_v8  ;;  %2435 = vmatprep.subr.bf16.mxu1 %v2744_v2 }
 0x435   : > { %2420 = vmatmul.mubr.msk.bf16.vlgmr.msra.gmra.mxu0 %vm636_vm4, %v604_v9 }
 0x436   : > { %2431 = vmatprep.mubr.msk.bf16.mxu0 %vm2745_vm0, %v2744_v2 }
 0x482   : > { %v677_v14 = vpop.f32.mrf.mxu1 }
 0x483   : > { %v830_v16 = vmul.f32 0.35355338, %v677_v14 }
 0x484   : > { %v2403_v17 = vpop.f32.mrf.mxu1 }
 0x485   : > { %v834_v18 = vsel %vm3000_vm6, %v830_v16, -1e+30 }
 0x486   : > { %v680_v19 = vpop.f32.mrf.mxu1  ;;  %v838_v20 = vsel %vm636_vm4, %v834_v18, -inf }
 0x487   : > { %839 = vmax.xlane.f32.xlu1 %v838_v20 }
 0x488   : > { %v2404_v21 = vpop.f32.mrf.mxu1 }
 0x498   : > { %620 = vrot.lane.b32.xlu1 %v2953_v36, %s2749_s15 }
 0x4e7   : > { %v726_v11 = vpop.f32.mrf.mxu1 }
 0x4e8   : > { %v831_v22 = vmul.f32 0.35355338, %v726_v11 }
 0x4e9   : > { %v2409_v12 = vpop.f32.mrf.mxu1 }
 0x4ea   : > { %v835_v23 = vsel %vm3000_vm6, %v831_v22, -1e+30 }
 0x4eb   : > { %v729_v25 = vpop.f32.mrf.mxu1  ;;  %v841_v26 = vsel %vm636_vm4, %v835_v23, -inf }
 0x4ec   : > { %842 = vmax.xlane.f32.xlu0 %v841_v26 }
 0x4ed   : > { %v2410_v27 = vpop.f32.mrf.mxu1 }
 0x4f1   : > { %v775_v28 = vpop.f32.mrf.mxu1 }
 0x4f2   : > { %v832_v29 = vmul.f32 0.35355338, %v775_v28 }
 0x4f3   : > { %v2415_v30 = vpop.f32.mrf.mxu1 }
 0x4f4   : > { %v836_v31 = vsel %vm3000_vm6, %v832_v29, -1e+30 }
 0x4f5   : > { %v778_v32 = vpop.f32.mrf.mxu1  ;;  %v824_v34 = vpop.f32.mrf.mxu0  ;;  %v844_v35 = vsel %vm636_vm4, %v836_v31, -inf }
 0x4f6   : > { %v833_v37 = vmul.f32 0.35355338, %v824_v34  ;;  %845 = vmax.xlane.f32.xlu0 %v844_v35 }
 0x4f7   : > { %v2416_v38 = vpop.f32.mrf.mxu1  ;;  %v2421_v40 = vpop.f32.mrf.mxu0 }
 0x4f8   : > { %v837_v41 = vsel %vm3000_vm6, %v833_v37, -1e+30  ;;  %v2609_v37 = vld [vmem:[%s3292_s4 + $0x8] sm:$0xff]   ;;  %v2610_v40 = vld [vmem:[%s3292_s4] sm:$0xff]  }
 0x4f9   : > { %v827_v42 = vpop.f32.mrf.mxu0  ;;  %v847_v44 = vsel %vm636_vm4, %v837_v41, -inf }
 0x4fa   : > { %848 = vmax.xlane.f32.xlu0 %v847_v44 }
 0x4fb   : > { %v2422_v45 = vpop.f32.mrf.mxu0 }
 0x510   : > { %v840_v46 = vpop.xlane.xlu1 %839 }
 0x511   : > { %v850_v47 = vsub.f32 %v834_v18, %v840_v46 }
 0x513   : > { %v854_v48 = vmul.f32 1.442695, %v850_v47 }
 0x514   : > { %v621_v49 = vpop.permute.xlu1 %620 }
 0x515   : > { %2633 = vpow2.f32 %v854_v48  ;;  %v630_v50 = vpack.c.bf16 %v621_v49, %v621_v49 }
 0x517   : > { %v937_v51 = vsel %vm889_vm5, %v630_v50, 0 }
 0x518   : > { %2430 = vmatpush3.bf16.msra.mxu0 %v937_v51 }
 0x519   : > { %2441 = vmatprep.subr.bf16.mxu0 %v2744_v2 }
 0x522   : > { %v2634_v52 = vpop.eup %2633 }
 0x523   : > { %v862_v53 = vsel %vm636_vm4, %v2634_v52, 0.0 }
 0x524   : > { %863 = vadd.xlane.f32.xlu1 %v862_v53 }
 0x575   : > { %v843_v54 = vpop.xlane.xlu0 %842 }
 0x576   : > { %v851_v55 = vsub.f32 %v835_v23, %v843_v54 }
 0x578   : > { %v856_v56 = vmul.f32 1.442695, %v851_v55 }
 0x57a   : > { %2635 = vpow2.f32 %v856_v56 }
 0x57f   : > { %v846_v57 = vpop.xlane.xlu0 %845 }
 0x580   : > { %v852_v58 = vsub.f32 %v836_v31, %v846_v57 }
 0x582   : > { %v858_v59 = vmul.f32 1.442695, %v852_v58 }
 0x583   : > { %v849_v60 = vpop.xlane.xlu0 %848 }
 0x584   : > { %2637 = vpow2.f32 %v858_v59  ;;  %v853_v61 = vsub.f32 %v837_v41, %v849_v60 }
 0x586   : > { %v860_v62 = vmul.f32 1.442695, %v853_v61 }
 0x587   : > { %v2636_v63 = vpop.eup %2635 }
 0x588   : > { %2639 = vpow2.f32 %v860_v62  ;;  %v865_v0 = vsel %vm636_vm4, %v2636_v63, 0.0 }
 0x589   : > { %866 = vadd.xlane.f32.xlu0 %v865_v0 }
 0x591   : > { %v2638_v3 = vpop.eup %2637 }
 0x592   : > { %v868_v4 = vsel %vm636_vm4, %v2638_v3, 0.0 }
 0x593   : > { %869 = vadd.xlane.f32.xlu1 %v868_v4 }
 0x595   : > { %v2640_v5 = vpop.eup %2639 }
 0x596   : > { %v871_v6 = vsel %vm636_vm4, %v2640_v5, 0.0 }
 0x597   : > { %872 = vadd.xlane.f32.xlu0 %v871_v6  ;;  %v2612_v6 = vld [vmem:[%s3294_s6] sm:$0xff]  }
 0x5a4   : > { %626 = vrot.lane.b32.xlu1 %v2953_v36, %s2751_s22 }
 0x5ad   : > { %v864_v7 = vpop.xlane.xlu1 %863  ;;  %623 = vrot.lane.b32.xlu0 %v2953_v36, %s3303_s16 }
 0x5ae   : > { %2641 = vrcp.f32 %v864_v7 }
 0x5bb   : > { %v2642_v8 = vpop.eup %2641 }
 0x5bc   : > { %v875_v9 = vmul.f32 %v2642_v8, %v2634_v52 }
 0x5be   : > { %v882_v10 = vpack.c.bf16 %v875_v9, %v875_v9 }
 0x5c0   : > { %2426 = vmatmul.mubr.msk.bf16.vlgmr.msra.gmra.mxu1 %vm636_vm4, %v882_v10  ;;  %v2253_v10 = vld [vmem:[%s3293_s5] ss:$0 sm:$0xff] }
 0x5c1   : > { %2437 = vmatprep.mubr.msk.bf16.mxu1 %vm2745_vm0, %v2744_v2 }
 0x612   : > { %v867_v14 = vpop.xlane.xlu0 %866 }
 0x613   : > { %2643 = vrcp.f32 %v867_v14 }
 0x61c   : > { %v870_v16 = vpop.xlane.xlu1 %869 }
 0x61d   : > { %2645 = vrcp.f32 %v870_v16 }
 0x620   : > { %v2644_v17 = vpop.eup %2643  ;;  %v627_v18 = vpop.permute.xlu1 %626 }
 0x621   : > { %v873_v19 = vpop.xlane.xlu0 %872  ;;  %v632_v20 = vpack.c.bf16 %v627_v18, %v627_v18  ;;  %v877_v21 = vmul.f32 %v2644_v17, %v2636_v63  ;;  %v2613_v18 = vld [vmem:[%s3295_s7 + $0x18] sm:$0xff]  }
 0x622   : > { %2647 = vrcp.f32 %v873_v19  ;;  %v2614_v19 = vld [vmem:[%s3295_s7 + $0x10] sm:$0xff]  }
 0x623   : > { %v1029_v36 = vsel %vm889_vm5, %v632_v20, 0  ;;  %v883_v11 = vpack.c.bf16 %v877_v21, %v877_v21  ;;  %v2615_v20 = vld [vmem:[%s3295_s7 + $0x8] sm:$0xff]  }
 0x625   : > { %v624_v22 = vpop.permute.xlu0 %623  ;;  %2432 = vmatmul.mubr.msk.bf16.vlgmr.msra.gmra.mxu0 %vm636_vm4, %v883_v11 }
 0x626   : > { %v631_v12 = vpack.c.bf16 %v624_v22, %v624_v22  ;;  %2442 = vmatpush3.bf16.msra.mxu0 %v1029_v36  ;;  %2443 = vmatprep.mubr.msk.bf16.mxu0 %vm2745_vm0, %v2744_v2 }
 0x627   : > { %2455 = vmatprep.subr.bf16.mxu0 %v2744_v2 }
 0x628   : > { %v983_v23 = vsel %vm889_vm5, %v631_v12, 0 }
 0x629   : > { %2436 = vmatpush3.bf16.msra.mxu1 %v983_v23 }
 0x62a   : > { %2447 = vmatprep.subr.bf16.mxu1 %v2744_v2  ;;  %v2646_v25 = vpop.eup %2645 }
 0x62b   : > { %v879_v26 = vmul.f32 %v2646_v25, %v2638_v3 }
 0x62d   : > { %v884_v27 = vpack.c.bf16 %v879_v26, %v879_v26 }
 0x62f   : > { %v2648_v28 = vpop.eup %2647  ;;  %2438 = vmatmul.mubr.msk.bf16.vlgmr.msra.gmra.mxu1 %vm636_vm4, %v884_v27 }
 0x630   : > { %v881_v29 = vmul.f32 %v2648_v28, %v2640_v5  ;;  %2451 = vmatprep.mubr.msk.bf16.mxu1 %vm2745_vm0, %v2744_v2  ;;  %2448 = vmatpush3.bf16.msra.mxu1 %v2609_v37  ;;  %v2611_v5 = vld [vmem:[%s3294_s6 + $0x8] sm:$0xff]  }
 0x631   : > { %2449 = vmatprep.subr.bf16.mxu1 %v2744_v2 }
 0x632   : > { %v885_v30 = vpack.c.bf16 %v881_v29, %v881_v29 }
 0x634   : > { %2444 = vmatmul.mubr.msk.bf16.vlgmr.msra.gmra.mxu0 %vm636_vm4, %v885_v30  ;;  %2450 = vmatpush3.bf16.msra.mxu1 %v2610_v40 }
 0x635   : > { %2459 = vmatprep.mubr.msk.bf16.mxu0 %vm2745_vm0, %v2744_v2  ;;  %2463 = vmatprep.subr.bf16.mxu1 %v2744_v2 }
 0x636   : > { %2456 = vmatpush3.bf16.msra.mxu0 %v2611_v5 }
 0x637   : > { %2457 = vmatprep.subr.bf16.mxu0 %v2744_v2 }
 0x63a   : > { %2458 = vmatpush3.bf16.msra.mxu0 %v2612_v6 }
 0x680   : > { %v927_v31 = vpop.f32.mrf.mxu1 }
 0x682   : > { %v2427_v32 = vpop.f32.mrf.mxu1 }
 0x684   : > { %v930_v34 = vpop.f32.mrf.mxu1 }
 0x686   : > { %v2428_v35 = vpop.f32.mrf.mxu1 }
 0x6e5   : > { %v973_v38 = vpop.f32.mrf.mxu0 }
 0x6e6   : > { %1072 = vrot.lane.b32.xlu1 %v973_v38, %s3302_s29  ;;  %s2314_s29 = sshll.u32 %s2837_s21, 7 }
 0x6e7   : > { %v2433_v41 = vpop.f32.mrf.mxu0 }
 0x6e8   : > { %v2617_v41 = vld [vmem:[%s3291_s3 + $0x30] ss:$8 sps:$4 sm:$0xff]  }
 0x6e9   : > { %v976_v42 = vpop.f32.mrf.mxu0 }
 0x6ea   : > { %v2619_v42 = vld [vmem:[%s3291_s3 + $0x34] ss:$8 sps:$4 sm:$0xff]  }
 0x6eb   : > { %v2434_v44 = vpop.f32.mrf.mxu0  ;;  %1372 = vmatprep.subr.bf16.mxu0 %v2619_v42 }
 0x6ec   : > { %v2622_v44 = vld [vmem:[%s3291_s3 + $0x24] ss:$8 sps:$4 sm:$0xff]  }
 0x6ef   : > { %v1019_v45 = vpop.f32.mrf.mxu1 }
 0x6f0   : > { %1076 = vrot.lane.b32.xlu1 %v1019_v45, %s3301_s14  ;;  %v2620_v45 = vld [vmem:[%s3291_s3 + $0x20] ss:$8 sps:$4 sm:$0xff]  }
 0x6f1   : > { %v2439_v46 = vpop.f32.mrf.mxu1 }
 0x6f3   : > { %v1022_v47 = vpop.f32.mrf.mxu1 }
 0x6f4   : > { %v1065_v48 = vpop.f32.mrf.mxu0 }
 0x6f5   : > { %1080 = vrot.lane.b32.xlu0 %v1065_v48, %s3300_s26  ;;  %v2440_v49 = vpop.f32.mrf.mxu1  ;;  %s3318_s26 = smov 24  }
 0x6f6   : > { %v2445_v50 = vpop.f32.mrf.mxu0 }
 0x6f7   : > { %v2264_v50 = vld [vmem:[%s3290_s2 + $0x1] ss:$0 sm:$0xff] }
 0x6f8   : > { %v1068_v51 = vpop.f32.mrf.mxu0 }
 0x6fa   : > { %v2446_v52 = vpop.f32.mrf.mxu0 }
 0x758   : > { %v1073_v53 = vpop.permute.xlu1 %1072 }
 0x759   : > { %v1083_v55 = vsel %vm636_vm4, %v927_v31, %v1073_v53 }
 0x762   : > { %v1077_v54 = vpop.permute.xlu1 %1076 }
 0x763   : > { %v1085_v56 = vsel %vm1084_vm7, %v1083_v55, %v1077_v54 }
 0x767   : > { %v1081_v57 = vpop.permute.xlu0 %1080 }
 0x768   : > { %v1087_v58 = vsel %vm1086_vm8, %v1085_v56, %v1081_v57 }
 0x769   : > { %v1088_v59 = vpack.c.bf16 %v1087_v58, %v1087_v58 }
 0x76b   : > { %2452 = vmatmul.mubr.msk.bf16.vlgmr.msra.gmra.mxu1 %vm481_vm3, %v1088_v59 }
 0x76c   : > { %2471 = vmatprep.mubr.msk.bf16.mxu1 %vm2745_vm0, %v2744_v2  ;;  %2464 = vmatpush3.bf16.msra.mxu1 %v2613_v18 }
 0x76d   : > { %2465 = vmatprep.subr.bf16.mxu1 %v2744_v2 }
 0x770   : > { %2466 = vmatpush3.bf16.msra.mxu1 %v2614_v19 }
 0x771   : > { %2467 = vmatprep.subr.bf16.mxu1 %v2744_v2 }
 0x774   : > { %2468 = vmatpush3.bf16.msra.mxu1 %v2615_v20 }
 0x775   : > { %2469 = vmatprep.subr.bf16.mxu1 %v2744_v2 }
 0x82b   : > { %v1142_v60 = vpop.f32.mrf.mxu1 }
 0x82c   : > { %v1148_v61 = vadd.f32 %v1142_v60, %v2914_v15 }
 0x82d   : > { %v2453_v62 = vpop.f32.mrf.mxu1 }
 0x82e   : > { %v1150_v63 = vmul.f32 %v1148_v61, %v1148_v61 }
 0x82f   : > { %v1145_v0 = vpop.f32.mrf.mxu1 }
 0x830   : > { %v1151_v3 = vsel %vm481_vm3, %v1150_v63, 0.0 }
 0x831   : > { %1152 = vadd.xlane.f32.xlu1 %v1151_v3  ;;  %v2454_v4 = vpop.f32.mrf.mxu1 }
 0x8ba   : > { %v1153_v15 = vpop.xlane.xlu1 %1152 }
 0x8bb   : > { %v1154_v7 = vmul.f32 0.03125, %v1153_v15 }
 0x8bd   : > { %v1155_v8 = vadd.f32 1e-06, %v1154_v7 }
 0x8bf   : > { %2649 = vrsqrt.f32 %v1155_v8 }
 0x8cc   : > { %v2650_v9 = vpop.eup %2649 }
 0x8cd   : > { %v1157_v14 = vmul.f32 %v2650_v9, %v1148_v61 }
 0x8cf   : > { %v1164_v16 = vmul.f32 %v2253_v10, %v1157_v14 }
 0x8d1   : > { %v1165_v17 = vpack.c.bf16 %v1164_v16, %v1164_v16 }
 0x8d3   : > { %2460 = vmatmul.mubr.msk.bf16.vlgmr.msra.gmra.mxu0 %vm481_vm3, %v1165_v17 }
 0x8d4   : > { %1392 = vmatprep.mubr.bf16.mxu0 %v2743_v1  ;;  %v2616_v1 = vld [vmem:[%s3295_s7] sm:$0xff]   ;;  %1373 = vmatpush1.bf16.msra.mxu0 %v2617_v41 }
 0x8d5   : > { %2470 = vmatpush3.bf16.msra.mxu1 %v2616_v1  ;;  %1374 = vmatprep.subr.bf16.mxu0 %v2622_v44 }
 0x8d6   : > { %2481 = vmatprep.subr.bf16.mxu1 %v2744_v2 }
 0x8d8   : > { %1375 = vmatpush1.bf16.msra.mxu0 %v2620_v45 }
 0x8d9   : > { %2475 = vmatprep.subr.bf16.mxu0 %v2744_v2 }
 0x993   : > { %v1219_v21 = vpop.f32.mrf.mxu0 }
 0x994   : > { %1233 = vrot.lane.b32.xlu0 %v1219_v21, %s3305_s30  ;;  %v2257_v12 = vmul.f32 -1.442695, %v1219_v21  ;;  %s3314_s30 = smov 112  }
 0x995   : > { %v2461_v36 = vpop.f32.mrf.mxu0 }
 0x996   : > { %2651 = vpow2.f32 %v2257_v12 }
 0x997   : > { %v1222_v11 = vpop.f32.mrf.mxu0 }
 0x999   : > { %v2462_v22 = vpop.f32.mrf.mxu0 }
 0x9a3   : > { %v2652_v23 = vpop.eup %2651 }
 0x9a4   : > { %v1228_v25 = vadd.f32 1.0, %v2652_v23 }
 0x9a6   : > { %2653 = vrcp.f32 %v1228_v25 }
 0x9b3   : > { %v2654_v26 = vpop.eup %2653 }
 0x9b4   : > { %v1231_v27 = vmul.f32 %v2654_v26, %v1219_v21 }
 0xa06   : > { %v1234_v28 = vpop.permute.xlu0 %1233 }
 0xa07   : > { %v1236_v29 = vmul.f32 %v1234_v28, %v1231_v27 }
 0xa09   : > { %v1237_v30 = vpack.c.bf16 %v1236_v29, %v1236_v29 }
 0xa0b   : > { %2472 = vmatmul.mubr.msk.bf16.vlgmr.msra.gmra.mxu1 %vm400_vm1, %v1237_v30 }
 0xa0c   : > { %2483 = vmatprep.mubr.msk.bf16.mxu1 %vm2745_vm0, %v2744_v2 }
 0xacb   : > { %v1307_v31 = vpop.f32.mrf.mxu1 }
 0xacc   : > { %v3095_v32 = vadd.f32 %v1307_v31, %v1148_v61 }
 0xacd   : > { %v2473_v34 = vpop.f32.mrf.mxu1 }
 0xace   : > { %v1316_v35 = vmul.f32 %v3095_v32, %v3095_v32 }
 0xacf   : > { %v1310_v37 = vpop.f32.mrf.mxu1 }
 0xad0   : > { %v1317_v38 = vsel %vm481_vm3, %v1316_v35, 0.0 }
 0xad1   : > { %1318 = vadd.xlane.f32.xlu0 %v1317_v38  ;;  %v2474_v40 = vpop.f32.mrf.mxu1 }
 0xb5a   : > { %v1319_v46 = vpop.xlane.xlu0 %1318 }
 0xb5b   : > { %v1320_v47 = vmul.f32 0.03125, %v1319_v46 }
 0xb5d   : > { %v1321_v48 = vadd.f32 1e-06, %v1320_v47 }
 0xb5f   : > { %2655 = vrsqrt.f32 %v1321_v48 }
 0xb6c   : > { %v2656_v49 = vpop.eup %2655 }
 0xb6d   : > { %v1323_v51 = vmul.f32 %v2656_v49, %v3095_v32 }
 0xb6f   : > { %v1330_v52 = vmul.f32 %v2264_v50, %v1323_v51 }
 0xb71   : > { %v1331_v53 = vpack.c.bf16 %v1330_v52, %v1330_v52 }
 0xb73   : > { %2273 = vmatmul.mubr.msk.bf16.vlgmr.msra.gmra.mxu0 %vm481_vm3, %v1331_v53 }
 0xb74   : > { %2477 = vmatprep.mubr.msk.bf16.mxu0 %vm2745_vm0, %v2744_v2 }
 0xc33   : > { %v1394_v54 = vpop.f32.mrf.mxu0 }
 0xc34   : > { %v1409_v55 = vmul.f32 %v1394_v54, %v2950_v33  ;;  %v1408_v59 = vmul.f32 %v1394_v54, %v2956_v39  ;;  %v1402_v62 = vmul.f32 %v1394_v54, %v2960_v43  ;;  %v1401_v39 = vmul.f32 %v1394_v54, %v2939_v24 }
 0xc35   : > { %v3121_v56 = vpop.f32.mrf.mxu0 }
 0xc36   : > { %1411 = vrot.lane.b32.xlu0 %v1409_v55, %s2746_s24  ;;  %v1453_v36 = vpack.c.bf16 %v3121_v56, %v3121_v56 }
 0xc37   : > { %v1398_v57 = vpop.f32.mrf.mxu0 }
 0xc38   : > { %v1713_v12 = vsel %vm889_vm5, %v1453_v36, 0 }
 0xc39   : > { %v1399_v58 = vpop.f32.mrf.mxu0 }
 0xca8   : > { %v1412_v60 = vpop.permute.xlu0 %1411 }
 0xca9   : > { %v1414_v61 = vadd.f32 %v1412_v60, %v1408_v59 }
 0xcab   : > { %1436 = vrot.lane.b32.xlu0 %v1414_v61, %s2751_s22  ;;  %1430 = vrot.lane.b32.xlu1 %v1414_v61, %s2749_s15  ;;  %v1439_v33 = vpack.c.bf16 %v1414_v61, %v1414_v61 }
 0xcaf   : > { %1404 = vrot.lane.b32.xlu1 %v1402_v62, %s2746_s24 }
 0xcb3   : > { %1433 = vrot.lane.b32.xlu1 %v1414_v61, %s3314_s30 }
 0xcb7   : > { %1458 = vrot.lane.b32.xlu1 %v1439_v33, %s3315_s12 }
 0xd1d   : > { %v1431_v63 = vpop.permute.xlu1 %1430  ;;  %v1437_v5 = vpop.permute.xlu0 %1436 }
 0xd1e   : > { %v1440_v0 = vpack.c.bf16 %v1431_v63, %v1431_v63  ;;  %v1442_v43 = vpack.c.bf16 %v1437_v5, %v1437_v5 }
 0xd20   : > { %1507 = vrot.lane.b32.xlu0 %v1440_v0, %s3315_s12 }
 0xd21   : > { %v1405_v3 = vpop.permute.xlu1 %1404 }
 0xd22   : > { %v1407_v4 = vadd.f32 %v1405_v3, %v1401_v39 }
 0xd24   : > { %1416 = vrot.lane.b32.xlu1 %v1407_v4, %s2749_s15  ;;  %v1425_v24 = vpack.c.bf16 %v1407_v4, %v1407_v4 }
 0xd25   : > { %v1434_v6 = vpop.permute.xlu1 %1433 }
 0xd26   : > { %v1441_v15 = vpack.c.bf16 %v1434_v6, %v1434_v6 }
 0xd28   : > { %1556 = vrot.lane.b32.xlu0 %v1441_v15, %s3315_s12  ;;  %1605 = vrot.lane.b32.xlu1 %v1442_v43, %s3315_s12 }
 0xd29   : > { %v1459_v7 = vpop.permute.xlu1 %1458 }
 0xd2a   : > { %v1464_v8 = vsel %vm636_vm4, %v1459_v7, 0 }
 0xd2b   : > { %2476 = vmatpush3.bf16.xpose.msra.mxu0 %v1464_v8 }
 0xd2c   : > { %1419 = vrot.lane.b32.xlu0 %v1407_v4, %s3314_s30  ;;  %1422 = vrot.lane.b32.xlu1 %v1407_v4, %s2751_s22 }
 0xd2d   : > { %2487 = vmatprep.subr.bf16.mxu0 %v2744_v2 }
 0xd32   : > { %2478 = vmatmul.mubr.msk.bf16.vlgmr.msra.gmra.mxu0 %vm636_vm4, %v1425_v24 }
 0xd33   : > { %2489 = vmatprep.mubr.msk.bf16.mxu0 %vm2745_vm0, %v2744_v2 }
 0xd92   : > { %v1508_v9 = vpop.permute.xlu0 %1507 }
 0xd93   : > { %v1513_v10 = vsel %vm636_vm4, %v1508_v9, 0 }
 0xd94   : > { %2482 = vmatpush3.bf16.xpose.msra.mxu1 %v1513_v10 }
 0xd95   : > { %2493 = vmatprep.subr.bf16.mxu1 %v2744_v2 }
 0xd96   : > { %v1417_v14 = vpop.permute.xlu1 %1416 }
 0xd97   : > { %v1426_v16 = vpack.c.bf16 %v1417_v14, %v1417_v14 }
 0xd9a   : > { %v1557_v17 = vpop.permute.xlu0 %1556  ;;  %v1606_v18 = vpop.permute.xlu1 %1605 }
 0xd9b   : > { %v1562_v19 = vsel %vm636_vm4, %v1557_v17, 0  ;;  %v1611_v20 = vsel %vm636_vm4, %v1606_v18, 0  ;;  %2484 = vmatmul.mubr.msk.bf16.vlgmr.msra.gmra.mxu1 %vm636_vm4, %v1426_v16 }
 0xd9c   : > { %2488 = vmatpush3.bf16.xpose.msra.mxu0 %v1562_v19  ;;  %2494 = vmatpush3.bf16.xpose.msra.mxu1 %v1611_v20 }
 0xd9d   : > { %2495 = vmatprep.mubr.msk.bf16.mxu1 %vm2745_vm0, %v2744_v2  ;;  %2499 = vmatprep.subr.bf16.mxu0 %v2744_v2 }
 0xd9e   : > { %v1420_v1 = vpop.permute.xlu0 %1419  ;;  %v1423_v21 = vpop.permute.xlu1 %1422  ;;  %2505 = vmatprep.subr.bf16.mxu1 %v2744_v2 }
 0xd9f   : > { %v1427_v11 = vpack.c.bf16 %v1420_v1, %v1420_v1  ;;  %v1428_v22 = vpack.c.bf16 %v1423_v21, %v1423_v21 }
 0xda3   : > { %2490 = vmatmul.mubr.msk.bf16.vlgmr.msra.gmra.mxu0 %vm636_vm4, %v1427_v11  ;;  %2496 = vmatmul.mubr.msk.bf16.vlgmr.msra.gmra.mxu1 %vm636_vm4, %v1428_v22 }
 0xda4   : > { %2500 = vmatpush3.bf16.msra.mxu0 %v1713_v12  ;;  %2501 = vmatprep.mubr.msk.bf16.mxu0 %vm2745_vm0, %v2744_v2 }
 0xda5   : > { %2511 = vmatprep.subr.bf16.mxu0 %v2744_v2  ;;  %2507 = vmatprep.mubr.msk.bf16.mxu1 %vm2745_vm0, %v2744_v2 }
 0xdf2   : > { %v1500_v23 = vpop.f32.mrf.mxu0 }
 0xdf3   : > { %v1653_v25 = vmul.f32 0.35355338, %v1500_v23 }
 0xdf4   : > { %v2479_v26 = vpop.f32.mrf.mxu0 }
 0xdf5   : > { %v1657_v27 = vsel %vm3000_vm6, %v1653_v25, -1e+30 }
 0xdf6   : > { %v1503_v28 = vpop.f32.mrf.mxu0  ;;  %v1661_v29 = vsel %vm636_vm4, %v1657_v27, -inf }
 0xdf7   : > { %1662 = vmax.xlane.f32.xlu0 %v1661_v29 }
 0xdf8   : > { %v2480_v30 = vpop.f32.mrf.mxu0 }
 0xe5b   : > { %v1549_v31 = vpop.f32.mrf.mxu1 }
 0xe5c   : > { %v1654_v34 = vmul.f32 0.35355338, %v1549_v31 }
 0xe5d   : > { %v2485_v35 = vpop.f32.mrf.mxu1 }
 0xe5e   : > { %v1658_v37 = vsel %vm3000_vm6, %v1654_v34, -1e+30 }
 0xe5f   : > { %v1552_v38 = vpop.f32.mrf.mxu1  ;;  %v1664_v40 = vsel %vm636_vm4, %v1658_v37, -inf }
 0xe60   : > { %1665 = vmax.xlane.f32.xlu1 %v1664_v40 }
 0xe61   : > { %v2486_v41 = vpop.f32.mrf.mxu1 }
 0xe63   : > { %v1598_v42 = vpop.f32.mrf.mxu0  ;;  %v1647_v44 = vpop.f32.mrf.mxu1 }
 0xe64   : > { %v1655_v45 = vmul.f32 0.35355338, %v1598_v42  ;;  %v1656_v46 = vmul.f32 0.35355338, %v1647_v44  ;;  %v2623_v44 = vld [vmem:[%s3292_s4 + $0x18] sm:$0xff]  }
 0xe65   : > { %v2491_v47 = vpop.f32.mrf.mxu0  ;;  %v2497_v48 = vpop.f32.mrf.mxu1 }
 0xe66   : > { %v1659_v49 = vsel %vm3000_vm6, %v1655_v45, -1e+30  ;;  %v1660_v53 = vsel %vm3000_vm6, %v1656_v46, -1e+30 }
 0xe67   : > { %v1601_v50 = vpop.f32.mrf.mxu0  ;;  %v1650_v51 = vpop.f32.mrf.mxu1  ;;  %v1667_v52 = vsel %vm636_vm4, %v1659_v49, -inf  ;;  %v1670_v57 = vsel %vm636_vm4, %v1660_v53, -inf }
 0xe68   : > { %1668 = vmax.xlane.f32.xlu0 %v1667_v52 }
 0xe69   : > { %v2492_v54 = vpop.f32.mrf.mxu0  ;;  %v2498_v55 = vpop.f32.mrf.mxu1 }
 0xe6c   : > { %1671 = vmax.xlane.f32.xlu0 %v1670_v57 }
 0xe80   : > { %v1663_v58 = vpop.xlane.xlu0 %1662 }
 0xe81   : > { %v1673_v59 = vsub.f32 %v1657_v27, %v1663_v58 }
 0xe83   : > { %v1677_v60 = vmul.f32 1.442695, %v1673_v59 }
 0xe85   : > { %2657 = vpow2.f32 %v1677_v60 }
 0xe92   : > { %v2658_v61 = vpop.eup %2657 }
 0xe93   : > { %v1685_v62 = vsel %vm636_vm4, %v2658_v61, 0.0 }
 0xe94   : > { %1686 = vadd.xlane.f32.xlu0 %v1685_v62 }
 0xee9   : > { %v1666_v33 = vpop.xlane.xlu1 %1665 }
 0xeea   : > { %v1674_v63 = vsub.f32 %v1658_v37, %v1666_v33 }
 0xeec   : > { %v1679_v0 = vmul.f32 1.442695, %v1674_v63 }
 0xeee   : > { %2659 = vpow2.f32 %v1679_v0 }
 0xef1   : > { %v1669_v39 = vpop.xlane.xlu0 %1668 }
 0xef2   : > { %v1675_v13 = vsub.f32 %v1659_v49, %v1669_v39 }
 0xef4   : > { %v1681_v3 = vmul.f32 1.442695, %v1675_v13 }
 0xef5   : > { %v1672_v15 = vpop.xlane.xlu0 %1671 }
 0xef6   : > { %2661 = vpow2.f32 %v1681_v3  ;;  %v1676_v7 = vsub.f32 %v1660_v53, %v1672_v15  ;;  %v2624_v53 = vld [vmem:[%s3292_s4 + $0x10] sm:$0xff]   ;;  %v2625_v15 = vld [vmem:[%s3294_s6 + $0x18] sm:$0xff]  }
 0xef8   : > { %v1683_v8 = vmul.f32 1.442695, %v1676_v7  ;;  %v2626_v7 = vld [vmem:[%s3294_s6 + $0x10] sm:$0xff]  }
 0xefb   : > { %v2660_v4 = vpop.eup %2659 }
 0xefc   : > { %v1688_v5 = vsel %vm636_vm4, %v2660_v4, 0.0 }
 0xefd   : > { %1689 = vadd.xlane.f32.xlu1 %v1688_v5 }
 0xf03   : > { %v2662_v6 = vpop.eup %2661 }
 0xf04   : > { %v1691_v43 = vsel %vm636_vm4, %v2662_v6, 0.0 }
 0xf05   : > { %1692 = vadd.xlane.f32.xlu0 %v1691_v43 }
 0xf0e   : > { %1447 = vrot.lane.b32.xlu1 %v3121_v56, %s3314_s30  ;;  %s2167_s30 = scalar_lea.hbm %s3299_s11, %s2314_s29 }
 0xf1b   : > { %1444 = vrot.lane.b32.xlu0 %v3121_v56, %s2749_s15 }
 0xf1d   : > { %v1687_v24 = vpop.xlane.xlu0 %1686 }
 0xf1e   : > { %2663 = vrcp.f32 %v1687_v24 }
 0xf1f   : > { %2665 = vpow2.f32 %v1683_v8 }
 0xf2b   : > { %v2664_v9 = vpop.eup %2663 }
 0xf2c   : > { %v1698_v10 = vmul.f32 %v2664_v9, %v2658_v61  ;;  %v2666_v14 = vpop.eup %2665 }
 0xf2d   : > { %v1694_v17 = vsel %vm636_vm4, %v2666_v14, 0.0 }
 0xf2e   : > { %v1705_v16 = vpack.c.bf16 %v1698_v10, %v1698_v10  ;;  %v2290_v10 = vld [vmem:[%s3293_s5 + $0x1] ss:$0 sm:$0xff] }
 0xf30   : > { %2502 = vmatmul.mubr.msk.bf16.vlgmr.msra.gmra.mxu0 %vm636_vm4, %v1705_v16 }
 0xf31   : > { %2513 = vmatprep.mubr.msk.bf16.mxu0 %vm2745_vm0, %v2744_v2 }
 0xf32   : > { %1695 = vadd.xlane.f32.xlu1 %v1694_v17 }
 0xf43   : > { %1450 = vrot.lane.b32.xlu1 %v3121_v56, %s2751_s22  ;;  %s3316_s22 = smov 8  }
 0xf86   : > { %v1690_v18 = vpop.xlane.xlu1 %1689 }
 0xf87   : > { %2667 = vrcp.f32 %v1690_v18  ;;  %v2627_v18 = vld [vmem:[%s3295_s7 + $0x38] sm:$0xff]  }
 0xf8a   : > { %v1448_v19 = vpop.permute.xlu1 %1447 }
 0xf8b   : > { %v1455_v20 = vpack.c.bf16 %v1448_v19, %v1448_v19  ;;  %v2628_v19 = vld [vmem:[%s3295_s7 + $0x30] sm:$0xff]  }
 0xf8d   : > { %v1805_v1 = vsel %vm889_vm5, %v1455_v20, 0  ;;  %v2629_v20 = vld [vmem:[%s3295_s7 + $0x28] sm:$0xff]  }
 0xf8e   : > { %2512 = vmatpush3.bf16.msra.mxu0 %v1805_v1  ;;  %v1693_v21 = vpop.xlane.xlu0 %1692  ;;  %v2630_v1 = vld [vmem:[%s3295_s7 + $0x20] sm:$0xff]  }
 0xf8f   : > { %2669 = vrcp.f32 %v1693_v21  ;;  %2523 = vmatprep.subr.bf16.mxu0 %v2744_v2 }
 0xf92   : > { %v1445_v36 = vpop.permute.xlu0 %1444 }
 0xf93   : > { %v1454_v11 = vpack.c.bf16 %v1445_v36, %v1445_v36 }
 0xf94   : > { %v2668_v22 = vpop.eup %2667 }
 0xf95   : > { %v1759_v12 = vsel %vm889_vm5, %v1454_v11, 0  ;;  %v1700_v23 = vmul.f32 %v2668_v22, %v2660_v4 }
 0xf96   : > { %2506 = vmatpush3.bf16.msra.mxu1 %v1759_v12 }
 0xf97   : > { %v1706_v25 = vpack.c.bf16 %v1700_v23, %v1700_v23  ;;  %2517 = vmatprep.subr.bf16.mxu1 %v2744_v2 }
 0xf99   : > { %2508 = vmatmul.mubr.msk.bf16.vlgmr.msra.gmra.mxu1 %vm636_vm4, %v1706_v25 }
 0xf9a   : > { %2519 = vmatprep.mubr.msk.bf16.mxu1 %vm2745_vm0, %v2744_v2 }
 0xf9c   : > { %v2670_v56 = vpop.eup %2669 }
 0xf9d   : > { %v1702_v26 = vmul.f32 %v2670_v56, %v2662_v6 }
 0xf9f   : > { %v1707_v27 = vpack.c.bf16 %v1702_v26, %v1702_v26 }
 0xfa1   : > { %2514 = vmatmul.mubr.msk.bf16.vlgmr.msra.gmra.mxu0 %vm636_vm4, %v1707_v27 }
 0xfa2   : > { %2527 = vmatprep.mubr.msk.bf16.mxu0 %vm2745_vm0, %v2744_v2  ;;  %2524 = vmatpush3.bf16.msra.mxu0 %v2623_v44 }
 0xfa3   : > { %2525 = vmatprep.subr.bf16.mxu0 %v2744_v2 }
 0xfa6   : > { %2526 = vmatpush3.bf16.msra.mxu0 %v2624_v53 }
 0xfa7   : > { %2539 = vmatprep.subr.bf16.mxu0 %v2744_v2 }
 0xfbb   : > { %v1696_v28 = vpop.xlane.xlu1 %1695 }
 0xfbc   : > { %2671 = vrcp.f32 %v1696_v28 }
 0xfbf   : > { %v1451_v29 = vpop.permute.xlu1 %1450 }
 0xfc0   : > { %v1456_v30 = vpack.c.bf16 %v1451_v29, %v1451_v29 }
 0xfc2   : > { %v1851_v31 = vsel %vm889_vm5, %v1456_v30, 0 }
 0xfc3   : > { %2518 = vmatpush3.bf16.msra.mxu1 %v1851_v31 }
 0xfc4   : > { %2531 = vmatprep.subr.bf16.mxu1 %v2744_v2 }
 0xfc9   : > { %v2672_v34 = vpop.eup %2671 }
 0xfca   : > { %v1704_v35 = vmul.f32 %v2672_v34, %v2666_v14 }
 0xfcc   : > { %v1708_v37 = vpack.c.bf16 %v1704_v35, %v1704_v35 }
 0xfce   : > { %2520 = vmatmul.mubr.msk.bf16.vlgmr.msra.gmra.mxu1 %vm636_vm4, %v1708_v37 }
 0xfcf   : > { %2535 = vmatprep.mubr.msk.bf16.mxu1 %vm2745_vm0, %v2744_v2  ;;  %2532 = vmatpush3.bf16.msra.mxu1 %v2625_v15 }
 0xfd0   : > { %2533 = vmatprep.subr.bf16.mxu1 %v2744_v2 }
 0xfd3   : > { %2534 = vmatpush3.bf16.msra.mxu1 %v2626_v7 }
 0xff0   : > { %v1749_v38 = vpop.f32.mrf.mxu0 }
 0xff2   : > { %v2503_v40 = vpop.f32.mrf.mxu0 }
 0xff4   : > { %v1752_v41 = vpop.f32.mrf.mxu0 }
 0xff6   : > { %v2504_v42 = vpop.f32.mrf.mxu0 }
0x1059   : > { %v1795_v45 = vpop.f32.mrf.mxu1 }
0x105a   : > { %1894 = vrot.lane.b32.xlu1 %v1795_v45, %s3316_s22  ;;  %v2312_v45 = vld [vmem:[%s3296_s8] ss:$0 sm:$0xff]  ;;  %s2755_s22 = smov [#allocation2]  }
0x105b   : > { %v2509_v46 = vpop.f32.mrf.mxu1 }
0x105d   : > { %v1798_v47 = vpop.f32.mrf.mxu1 }
0x105f   : > { %v2510_v48 = vpop.f32.mrf.mxu1 }
0x1061   : > { %v1841_v49 = vpop.f32.mrf.mxu0 }
0x1062   : > { %1898 = vrot.lane.b32.xlu0 %v1841_v49, %s3317_s13  ;;  %s2685_s13 = sshll.u32 %s2755_s22, 4  ;;  %s2686_s13 = int_to_ptr.vmem [resolvable:$false] %s2685_s13 }
0x1063   : > { %v2515_v50 = vpop.f32.mrf.mxu0  ;;  %s2687_s21 = scalar_lea.vmem %s2686_s13, 256 }
0x1065   : > { %v1844_v51 = vpop.f32.mrf.mxu0 }
0x1067   : > { %v2516_v52 = vpop.f32.mrf.mxu0 }
0x108e   : > { %v1887_v54 = vpop.f32.mrf.mxu1 }
0x108f   : > { %1902 = vrot.lane.b32.xlu1 %v1887_v54, %s3318_s26 }
0x1090   : > { %v2521_v55 = vpop.f32.mrf.mxu1 }
0x1092   : > { %v1890_v57 = vpop.f32.mrf.mxu1 }
0x1094   : > { %v2522_v58 = vpop.f32.mrf.mxu1 }
0x10cc   : > { %v1895_v59 = vpop.permute.xlu1 %1894 }
0x10cd   : > { %v1905_v61 = vsel %vm636_vm4, %v1749_v38, %v1895_v59 }
0x10d4   : > { %v1899_v60 = vpop.permute.xlu0 %1898 }
0x10d5   : > { %v1906_v62 = vsel %vm1084_vm7, %v1905_v61, %v1899_v60 }
0x1101   : > { %v1903_v33 = vpop.permute.xlu1 %1902 }
0x1102   : > { %v1907_v63 = vsel %vm1086_vm8, %v1906_v62, %v1903_v33 }
0x1103   : > { %v1908_v0 = vpack.c.bf16 %v1907_v63, %v1907_v63 }
0x1105   : > { %2528 = vmatmul.mubr.msk.bf16.vlgmr.msra.gmra.mxu0 %vm481_vm3, %v1908_v0 }
0x1106   : > { %2547 = vmatprep.mubr.msk.bf16.mxu0 %vm2745_vm0, %v2744_v2  ;;  %2540 = vmatpush3.bf16.msra.mxu0 %v2627_v18 }
0x1107   : > { %2541 = vmatprep.subr.bf16.mxu0 %v2744_v2 }
0x110a   : > { %2542 = vmatpush3.bf16.msra.mxu0 %v2628_v19 }
0x110b   : > { %2543 = vmatprep.subr.bf16.mxu0 %v2744_v2 }
0x110e   : > { %2544 = vmatpush3.bf16.msra.mxu0 %v2629_v20 }
0x110f   : > { %2545 = vmatprep.subr.bf16.mxu0 %v2744_v2 }
0x1112   : > { %2546 = vmatpush3.bf16.msra.mxu0 %v2630_v1 }
0x11c5   : > { %v1963_v39 = vpop.f32.mrf.mxu0 }
0x11c6   : > { %v1969_v13 = vadd.f32 %v1963_v39, %v3095_v32 }
0x11c7   : > { %v2529_v3 = vpop.f32.mrf.mxu0 }
0x11c8   : > { %v1972_v4 = vmul.f32 %v1969_v13, %v1969_v13 }
0x11c9   : > { %v1966_v5 = vpop.f32.mrf.mxu0 }
0x11ca   : > { %v1973_v6 = vsel %vm481_vm3, %v1972_v4, 0.0 }
0x11cb   : > { %1974 = vadd.xlane.f32.xlu0 %v1973_v6  ;;  %v2530_v43 = vpop.f32.mrf.mxu0 }
0x1254   : > { %v1975_v32 = vpop.xlane.xlu0 %1974 }
0x1255   : > { %v1976_v8 = vmul.f32 0.03125, %v1975_v32 }
0x1257   : > { %v1977_v24 = vadd.f32 1e-06, %v1976_v8 }
0x1259   : > { %2673 = vrsqrt.f32 %v1977_v24 }
0x1266   : > { %v2674_v9 = vpop.eup %2673 }
0x1267   : > { %v1979_v14 = vmul.f32 %v2674_v9, %v1969_v13 }
0x1269   : > { %v1986_v16 = vmul.f32 %v2290_v10, %v1979_v14 }
0x126b   : > { %v1987_v17 = vpack.c.bf16 %v1986_v16, %v1986_v16 }
0x126d   : > { %2536 = vmatmul.mubr.msk.bf16.vlgmr.msra.gmra.mxu1 %vm481_vm3, %v1987_v17 }
0x132d   : > { %v2042_v21 = vpop.f32.mrf.mxu1 }
0x132e   : > { %2056 = vrot.lane.b32.xlu1 %v2042_v21, %s3315_s12  ;;  %v2298_v12 = vmul.f32 -1.442695, %v2042_v21  ;;  %s375_s12 = sand.u32 1, %s2733_s18  }
0x132f   : > { %v2537_v36 = vpop.f32.mrf.mxu1  ;;  %s2232_s15 = sshll.u32 %s375_s12, 3  ;;  %s2156_s24 = scalar_lea.sflag [#allocation3], %s375_s12 }
0x1330   : > { %2675 = vpow2.f32 %v2298_v12  ;;  %s377_s14 = scalar_lea.vmem [#allocation2], %s2232_s15 }
0x1331   : > { %v2045_v11 = vpop.f32.mrf.mxu1  ;;  %s2169_s26 = sshll.u32 %s377_s14, 4  ;;  %s2170_s26 = int_to_ptr.vmem [resolvable:$true] %s2169_s26 }
0x1332   : > { %s2681_s0 = scalar_lea.vmem %s2170_s26, 128  ;;  %p2688_p0 = scmp.lt.s32.totalorder %s2170_s26, %s2686_s13 }
0x1333   : > { %v2538_v22 = vpop.f32.mrf.mxu1  ;;  %p2682_p11 = scmp.ne.s32.totalorder %s2170_s26, %s2681_s0  ;;  %p2689_p1 = scmp.lt.s32.totalorder %s2687_s21, %s2681_s0 }
0x1335   : > { %p2683_p12 = pnand %p2682_p11, %p2854_p5  ;;  %p2690_p2 = por %p2689_p1, %p2688_p0 }
0x1337   : > { %p2684_p13 = pneg %p2683_p12 }
0x1339   : > { %p2691_p3 = pnand %p2690_p2, %p2684_p13 }
0x133d   : > { %v2676_v23 = vpop.eup %2675 }
0x133e   : > { %v2051_v25 = vadd.f32 1.0, %v2676_v23 }
0x1340   : > { %2677 = vrcp.f32 %v2051_v25 }
0x134d   : > { %v2678_v56 = vpop.eup %2677 }
0x134e   : > { %v2054_v26 = vmul.f32 %v2678_v56, %v2042_v21 }
0x13a0   : > { %v2057_v27 = vpop.permute.xlu1 %2056 }
0x13a1   : > { %v2059_v2 = vmul.f32 %v2057_v27, %v2054_v26 }
0x13a3   : > { %v2060_v28 = vpack.c.bf16 %v2059_v2, %v2059_v2 }
0x13a5   : > { %2548 = vmatmul.mubr.msk.bf16.vlgmr.msra.gmra.mxu0 %vm400_vm1, %v2060_v28 }
0x1465   : > { %v2131_v29 = vpop.f32.mrf.mxu0 }
0x1466   : > { %v2137_v30 = vadd.f32 %v2131_v29, %v1969_v13 }
0x1467   : > { %v2549_v31 = vpop.f32.mrf.mxu0 }
0x1468   : > { %v2139_v34 = vmul.f32 %v2137_v30, %v2137_v30 }
0x1469   : > { %v2134_v35 = vpop.f32.mrf.mxu0 }
0x146a   : > { %v2140_v37 = vsel %vm481_vm3, %v2139_v34, 0.0 }
0x146b   : > { %2141 = vadd.xlane.f32.xlu1 %v2140_v37  ;;  %v2550_v38 = vpop.f32.mrf.mxu0 }
0x14f4   : > { %v2142_v40 = vpop.xlane.xlu1 %2141 }
0x14f5   : > { %v2143_v41 = vmul.f32 0.03125, %v2142_v40 }
0x14f7   : > { %v2144_v42 = vadd.f32 1e-06, %v2143_v41 }
0x14f9   : > { %2679 = vrsqrt.f32 %v2144_v42 }
0x1506   : > { %v2680_v44 = vpop.eup %2679 }
0x1507   : > { %v2146_v46 = vmul.f32 %v2680_v44, %v2137_v30 }
0x1509   : > { %v2153_v47 = vmul.f32 %v2312_v45, %v2146_v46 }
0x150b   : > { %2154 = vst.msk [vmem:[%s377_s14] sm:$0xff] %vm481_vm3, %v2153_v47 }
0x150c   : > { %2694 = shalt.err (!%p2691_p3)
}
0x150d   : > { %s2695_s15 = scalar_lea.hbm %s2167_s30, 128  ;;  %s2699_s14 = scalar_lea.hbm %s3299_s11, 256 }
0x150e   : > { %p2696_p4 = scmp.ne.s32.totalorder %s2167_s30, %s2695_s15  ;;  %p2700_p9 = scmp.lt.s32.totalorder %s2167_s30, %s3299_s11 }
0x150f   : > { %p2701_p10 = scmp.lt.s32.totalorder %s2699_s14, %s2695_s15 }
0x1510   : > { %p2697_p7 = pnand %p2696_p4, %p2854_p5 }
0x1511   : > { %p2702_p11 = por %p2701_p10, %p2700_p9 }
0x1512   : > { %p2698_p8 = pneg %p2697_p7 }
0x1514   : > { %p2703_p12 = pnand %p2702_p11, %p2698_p8 }
0x1516   : > { %2706 = shalt.err (!%p2703_p12)
}
0x1517   : > { %2551 = dma.vmem_to_hbm [thread:$0]  (%p2854_p5), %s2170_s26, 128, %s2167_s30, %s2156_s24  }
0x1518 PF: > { %p2557_p13 = scmp.ge.s32.totalorder %s2741_s20, 2  ;;  %s2181_s0 = sand.u32 1, %s2729_s17  }
0x1519   : > { %s2182_s22 = scalar_lea.sflag [#allocation3], %s2181_s0 }
0x151a   : > { %p2554_p0 = pnand %p2557_p13, %p2858_p6 }
0x151c   : > { %p2555_p1 = pneg %p2554_p0 }
0x151e   : > { %2724 = dma.done.wait (%p2555_p1), %s2182_s22, 128  }
0x151f   : > { %2726 = vsyncadd (%p2555_p1), %s2182_s22, 4294967168  ;;  %s3319_s13 = sld [smem:[#allocation5_spill]]  ;;  %p21_p2 = scmp.ge.s32.totalorder %s2841_s23, 4  }
0x1520   : > { %s3320_s17 = smov %s2733_s18  ;;  %s3321_s18 = smov %s2737_s19 }
0x1521   : > { %s3323_s20 = smov %s2841_s23  ;;  %23 = sbr.rel (!%p21_p2) target bundleno = 5 (0x5), region = 105 }
0x1525   : > { %s3322_s19 = smov %s3319_s13 }
0x1526   :  { %2187 = vsyncpa [#allocation3], 1 }
0x1527   :  { %2189 = vsyncpa [#allocation3 + $0x1], 1 }

</bundles_post_ra>
